<compile_context>
chip_gen: v7x
topology: tpu7x:2x2x1
jax: 0.10.0
libtpu: 0.0.40
codegen_flags: <defaults>
</compile_context>

<pallas_src>
import functools

import jax
import jax.numpy as jnp
from jax import lax
from jax.experimental import pallas as pl
from jax.experimental.pallas import tpu as pltpu


def _round_up(x, m):
    return ((x + m - 1) // m) * m


def _fold_bn(bn, eps):
    gamma, beta, mean, var = bn
    scale = gamma / jnp.sqrt(var + eps)
    shift = beta - mean * scale
    return scale, shift


# ------------------------------ Pallas kernel --------------------------------

def _bottleneck_kernel(x_ref, w1_ref, s1_ref, w2_ref, s2_ref, w3_ref, s3_ref,
                       o_ref, t1_ref, pk_ref, *, W, d, M, pf, TM):
    """Fused Bottleneck forward, one (batch, row-band) tile per grid step.

    x_ref   (1, MB, 16, Cin) bf16  whole flattened NHWC image in 16-row blocks
                                   (also the residual); rows padded to 16*MB.
    w1_ref  (Cin, Pp)        bf16  conv1 with bn1 scale folded, out-ch padded.
    s1_ref  (1, Pp)          f32   bn1 shift.
    w2_ref  (9*Pp, Pp)       bf16  conv2 taps stacked along K (tap*Pp + cin).
    s2_ref  (1, Pp)          f32   bn2 shift.
    w3_ref  (Pp, Cout)       bf16  conv3 with bn3 scale folded.
    s3_ref  (1, Cout)        f32   bn3 shift.
    o_ref   (1, TM, Cout)    bf16  output band (TM = band_rows * W pixels).
    t1_ref  (NTB, 16, Pp)    bf16  persistent conv1 output for the whole image,
                                   with `pf` zero rows in front and a zero tail.
    pk_ref  (TM, 9*Pp)       bf16  packed 3x3 taps for the long-K conv2 matmul.
    """
    b = pl.program_id(1)
    MB = x_ref.shape[1]              # 16-row input blocks (rows padded to 16*MB)
    M16 = MB * 16
    Cin = x_ref.shape[3]
    Pp = w1_ref.shape[1]
    NTB = t1_ref.shape[0]
    pfb = pf // 16
    TMB = TM // 16                   # exact whenever more than one band is used
    nblk = TM // 16 + (2 if TM % 16 else 1)   # blocks covering r + TM rows

    # ---- band 0: conv1 (1x1) + bn1 + relu over the WHOLE image --------------
    # Written once per batch element into the persistent bf16 scratch (single
    # cast).  The vertical halo (front pad + everything past the last real row)
    # is zeroed here too: the scratch persists across the band axis, and on
    # megacore each core owns its own scratch, so this is keyed on b == 0.
    @pl.when(b == 0)
    def _():
        xin = x_ref[0].reshape(M16, Cin)
        t1 = jnp.dot(xin, w1_ref[...], preferred_element_type=jnp.float32)
        t1 = jnp.maximum(t1 + s1_ref[...], 0.0).astype(jnp.bfloat16)
        t1_ref[pfb:pfb + MB] = t1.reshape(MB, 16, Pp)
        t1_ref[0:pfb] = jnp.zeros((pfb, 16, Pp), jnp.bfloat16)
        z0 = pf + M                  # first row past the real image
        zb = z0 // 16
        zr = z0 % 16
        if zr:
            t1_ref[zb, zr:, :] = jnp.zeros((16 - zr, Pp), jnp.bfloat16)
            zb += 1
        t1_ref[zb:] = jnp.zeros((NTB - zb, 16, Pp), jnp.bfloat16)

    # ---- conv2 (3x3, dilation d, padding d) + bn2 + relu ---------------------
    # Pack the 9 shifted + edge-masked taps of this band contiguously and do a
    # single long-K matmul so the MXU accumulates internally.  Column wrap of
    # the flattened +-d shifts is killed by the left/right masks; vertical
    # out-of-image reads hit the zero halo.
    if W % 8 == 0:
        col = lax.broadcasted_iota(jnp.int32, (TM // W, W, Pp), 1).reshape(TM, Pp)
    else:
        col = lax.broadcasted_iota(jnp.int32, (TM, Pp), 0) % W
    mask_l = col >= d
    mask_r = col < (W - d)
    zero = jnp.zeros((TM, Pp), jnp.bfloat16)

    for kh in range(3):
        for kw in range(3):
            s = pf + (kh - 1) * d * W + (kw - 1) * d     # static offset, >= 0
            gb = b * TMB + s // 16                        # aligned 16-row block
            r = s % 16                                    # static residual shift
            win = t1_ref[pl.ds(gb, nblk)].reshape(nblk * 16, Pp)[r:r + TM, :]
            if kw == 0:
                win = jnp.where(mask_l, win, zero)
            elif kw == 2:
                win = jnp.where(mask_r, win, zero)
            j = kh * 3 + kw
            pk_ref[:, j * Pp:(j + 1) * Pp] = win

    t2 = jnp.dot(pk_ref[...], w2_ref[...], preferred_element_type=jnp.float32)
    t2 = jnp.maximum(t2 + s2_ref[...], 0.0).astype(jnp.bfloat16)

    # ---- conv3 (1x1) + bn3 + residual add + relu, bf16 writeback -------------
    rb = TM // 16 + (1 if TM % 16 else 0)
    res = x_ref[0, pl.ds(b * TMB, rb)].reshape(rb * 16, Cin)[0:TM, :]
    out = jnp.dot(t2, w3_ref[...], preferred_element_type=jnp.float32)
    out = out + s3_ref[...] + res.astype(jnp.float32)
    o_ref[0] = jnp.maximum(out, 0.0).astype(o_ref.dtype)


# ------------------------------- wrappers ------------------------------------

def bottleneck_forward_nhwc(x_nhwc, params, stride=1, dilation=(1, 1),
                            eps=1e-5, band_rows=None):
    """DRN Bottleneck (downsample=None), NHWC in / NHWC out (bf16), eval-mode BN."""
    assert stride == 1, "stride>1 needs a downsample branch (not implemented)"
    N, H, W, Cin = x_nhwc.shape
    d = int(dilation[1])
    assert 1 <= d < W, "flat-shift conv2 assumes 1 <= dilation < W"
    P = params["w1"].shape[1]
    Cout = params["w3"].shape[1]
    assert Cout == 4 * P and Cout == Cin, \
        "residual add without downsample needs inplanes == 4*planes"
    M = H * W

    Pp = _round_up(P, 128)           # lane-dense intermediate channels

    # ---- spatial row-band tiling --------------------------------------------
    if band_rows is None:
        band_rows = H
        for th in range(H, 0, -1):
            if H % th == 0 and th * W <= 2048 and (th * W) % 16 == 0:
                band_rows = th
                break
    TH = int(band_rows)
    assert H % TH == 0, "band_rows must divide H"
    NB = H // TH
    TM = TH * W
    if NB > 1:
        assert TM % 16 == 0, "band size (band_rows * W) must be a multiple of 16"

    # ---- fold eval-mode BN into the conv weights + per-channel shifts --------
    s1, b1 = _fold_bn(params["bn1"], eps)
    s2, b2 = _fold_bn(params["bn2"], eps)
    s3, b3 = _fold_bn(params["bn3"], eps)

    w1 = jnp.pad(params["w1"] * s1[None, :], ((0, 0), (0, Pp - P)))
    w1 = w1.astype(jnp.bfloat16)                                   # (Cin, Pp)
    sh1 = jnp.pad(b1, (0, Pp - P)).reshape(1, Pp).astype(jnp.float32)

    w2 = params["w2"] * s2[None, None, None, :]                    # (3,3,P,P) HWIO
    w2 = jnp.pad(w2, ((0, 0), (0, 0), (0, Pp - P), (0, Pp - P)))
    w2 = w2.reshape(9 * Pp, Pp).astype(jnp.bfloat16)               # K = tap*Pp + cin
    sh2 = jnp.pad(b2, (0, Pp - P)).reshape(1, Pp).astype(jnp.float32)

    w3 = jnp.pad(params["w3"] * s3[None, :], ((0, Pp - P), (0, 0)))
    w3 = w3.astype(jnp.bfloat16)                                   # (Pp, Cout)
    sh3 = b3.reshape(1, Cout).astype(jnp.float32)

    # ---- flattened bf16 activations, rows padded to 16 and pre-blocked -------
    M16 = _round_up(M, 16)
    x_flat = x_nhwc.reshape(N, M, Cin).astype(jnp.bfloat16)
    if M16 != M:
        x_flat = jnp.pad(x_flat, ((0, 0), (0, M16 - M), (0, 0)))
    x_blk = x_flat.reshape(N, M16 // 16, 16, Cin)

    halo = d * W + d
    pf = _round_up(halo, 16)                         # zero front pad (16-aligned)
    mpadb = pl.cdiv(pf + max(M16, M + halo) + 32, 16)  # scratch blocks (+overshoot)

    kernel = functools.partial(_bottleneck_kernel, W=W, d=d, M=M, pf=pf, TM=TM)
    const = lambda n, b: (0, 0)

    # VMEM budget from the actual blocks (v5e scoped default is only 16 MiB).
    vmem_bytes = (
        2 * (M16 * Cin * 2)                               # x (double-buffered)
        + 2 * (TM * Cout * 2)                             # out (double-buffered)
        + 2 * (Cin * Pp + 9 * Pp * Pp + Pp * Cout) * 2    # weights
        + 4 * (2 * Pp + Cout) * 4                         # shifts
        + (mpadb * 16 * Pp + TM * 9 * Pp) * 2             # scratch
        + (M16 * Pp) * 6 + (TM * (Pp + Cout)) * 8         # in-kernel temporaries
    )
    vmem_limit = min(max(int(1.5 * vmem_bytes), 32 * 1024 * 1024),
                     100 * 1024 * 1024)

    out = pl.pallas_call(
        kernel,
        out_shape=jax.ShapeDtypeStruct((N, M, Cout), jnp.bfloat16),
        grid=(N, NB),
        in_specs=[
            pl.BlockSpec((1, M16 // 16, 16, Cin), lambda n, b: (n, 0, 0, 0)),
            pl.BlockSpec((Cin, Pp), const),                # w1
            pl.BlockSpec((1, Pp), const),                  # bn1 shift
            pl.BlockSpec((9 * Pp, Pp), const),             # w2 (packed taps)
            pl.BlockSpec((1, Pp), const),                  # bn2 shift
            pl.BlockSpec((Pp, Cout), const),               # w3
            pl.BlockSpec((1, Cout), const),                # bn3 shift
        ],
        out_specs=pl.BlockSpec((1, TM, Cout), lambda n, b: (n, b, 0)),
        scratch_shapes=[pltpu.VMEM((mpadb, 16, Pp), jnp.bfloat16),   # conv1 out
                        pltpu.VMEM((TM, 9 * Pp), jnp.bfloat16)],     # packed taps
        compiler_params=pltpu.CompilerParams(
            dimension_semantics=("parallel", "arbitrary"),
            vmem_limit_bytes=vmem_limit),
    )(x_blk, w1, sh1, w2, sh2, w3, sh3)

    return out.reshape(N, H, W, Cout)


def bottleneck_forward(x_nchw, params, stride=1, dilation=(1, 1), eps=1e-5,
                       band_rows=None):
    """NCHW boundary wrapper (PyTorch layout).  Prefer the NHWC entry point."""
    x_nhwc = jnp.transpose(x_nchw, (0, 2, 3, 1))
    y = bottleneck_forward_nhwc(x_nhwc, params, stride=stride,
                                dilation=dilation, eps=eps, band_rows=band_rows)
    return jnp.transpose(y, (0, 3, 1, 2))


# ----------------------------- pure-JAX reference ----------------------------

def bottleneck_reference(x_nchw, params, dilation=(1, 1), eps=1e-5,
                         compute_dtype=jnp.float32):
    """Reference forward.  compute_dtype=bfloat16 mirrors the kernel's MXU casts."""
    d = int(dilation[1])
    cast = lambda a: a.astype(compute_dtype).astype(jnp.float32)
    x = cast(jnp.transpose(x_nchw, (0, 2, 3, 1)))

    s1, b1 = _fold_bn(params["bn1"], eps)
    s2, b2 = _fold_bn(params["bn2"], eps)
    s3, b3 = _fold_bn(params["bn3"], eps)

    t1 = jnp.einsum("nhwc,cp->nhwp", x, cast(params["w1"] * s1[None, :])) + b1
    t1 = cast(jnp.maximum(t1, 0.0))

    t2 = lax.conv_general_dilated(
        t1, cast(params["w2"] * s2[None, None, None, :]),
        window_strides=(1, 1), padding=[(d, d), (d, d)], rhs_dilation=(d, d),
        dimension_numbers=("NHWC", "HWIO", "NHWC"),
        preferred_element_type=jnp.float32) + b2
    t2 = cast(jnp.maximum(t2, 0.0))

    out = jnp.einsum("nhwp,po->nhwo", t2, cast(params["w3"] * s3[None, :])) + b3
    out = jnp.maximum(out + x, 0.0)
    return jnp.transpose(out, (0, 3, 1, 2))


# ---------------------------------- main --------------------------------------

if __name__ == "__main__":
    key = jax.random.PRNGKey(0)
    N, inplanes, H, W = 2, 16, 16, 16
    planes = 4                                   # expansion 4 -> 16 out channels

    keys = jax.random.split(key, 16)
    x = jax.random.normal(keys[0], (N, inplanes, H, W), jnp.float32)

    def make_bn(kg, kb, km, kv, c):
        gamma = 1.0 + 0.1 * jax.random.normal(kg, (c,), jnp.float32)
        beta = 0.1 * jax.random.normal(kb, (c,), jnp.float32)
        mean = 0.1 * jax.random.normal(km, (c,), jnp.float32)
        var = jnp.abs(jax.random.normal(kv, (c,), jnp.float32)) + 0.5
        return (gamma, beta, mean, var)

    params = {
        "w1": 0.1 * jax.random.normal(keys[1], (inplanes, planes), jnp.float32),
        "w2": 0.1 * jax.random.normal(keys[2], (3, 3, planes, planes), jnp.float32),
        "w3": 0.1 * jax.random.normal(keys[3], (planes, 4 * planes), jnp.float32),
        "bn1": make_bn(keys[4], keys[5], keys[6], keys[7], planes),
        "bn2": make_bn(keys[8], keys[9], keys[10], keys[11], planes),
        "bn3": make_bn(keys[12], keys[13], keys[14], keys[15], 4 * planes),
    }

    fwd = jax.jit(bottleneck_forward,
                  static_argnames=("stride", "dilation", "eps", "band_rows"))

    for dil in ((1, 1), (2, 2)):
        for band_rows in (None, 8):              # whole-image and 2-band paths
            out = fwd(x, params, stride=1, dilation=dil, band_rows=band_rows)
            out = jax.block_until_ready(out)
            assert out.shape == (N, 4 * planes, H, W), out.shape
            out32 = out.astype(jnp.float32)

            # strict check vs a reference mirroring the kernel's bf16 MXU casts
            ref_b = bottleneck_reference(x, params, dilation=dil,
                                         compute_dtype=jnp.bfloat16)
            err_b = float(jnp.max(jnp.abs(out32 - ref_b)))
            assert err_b < 5e-2, \
                f"dilation={dil} bands={band_rows}: err vs bf16 ref {err_b}"

            # loose sanity check vs the full-f32 eval-mode reference
            ref_f = bottleneck_reference(x, params, dilation=dil,
                                         compute_dtype=jnp.float32)
            err_f = float(jnp.max(jnp.abs(out32 - ref_f)))
            assert err_f < 0.25, \
                f"dilation={dil} bands={band_rows}: err vs f32 ref {err_f}"

    print("KERNEL_OK")
</pallas_src>

<mosaic_0001>
module attributes {stable_mosaic.version = 11 : i64} {
  func.func @_bottleneck_kernel(%arg0: i32, %arg1: i32, %arg2: memref<1x16x16x16xbf16, #tpu.memory_space<vmem>>, %arg3: memref<16x128xbf16, #tpu.memory_space<vmem>>, %arg4: memref<1x128xf32, #tpu.memory_space<vmem>>, %arg5: memref<1152x128xbf16, #tpu.memory_space<vmem>>, %arg6: memref<1x128xf32, #tpu.memory_space<vmem>>, %arg7: memref<128x16xbf16, #tpu.memory_space<vmem>>, %arg8: memref<1x16xf32, #tpu.memory_space<vmem>>, %arg9: memref<1x256x16xbf16, #tpu.memory_space<vmem>>, %arg10: memref<22x16x128xbf16, #tpu.memory_space<vmem>>, %arg11: memref<256x1152xbf16, #tpu.memory_space<vmem>>) attributes {dimension_semantics = [#tpu.dimension_semantics<parallel>, #tpu.dimension_semantics<arbitrary>], iteration_bounds = array<i64: 2, 1>, scalar_prefetch = 0 : i64, scratch_operands = 2 : i64, tpu.core_type = #tpu.core_type<tc>, window_params = [{transform_indices = @transform_0, window_bounds = array<i64: 1, 16, 16, 16>}, {pipeline_mode = #tpu.pipeline_mode<synchronous>, transform_indices = @transform_1, window_bounds = array<i64: 16, 128>}, {pipeline_mode = #tpu.pipeline_mode<synchronous>, transform_indices = @transform_2, window_bounds = array<i64: 1, 128>}, {pipeline_mode = #tpu.pipeline_mode<synchronous>, transform_indices = @transform_3, window_bounds = array<i64: 1152, 128>}, {pipeline_mode = #tpu.pipeline_mode<synchronous>, transform_indices = @transform_4, window_bounds = array<i64: 1, 128>}, {pipeline_mode = #tpu.pipeline_mode<synchronous>, transform_indices = @transform_5, window_bounds = array<i64: 128, 16>}, {pipeline_mode = #tpu.pipeline_mode<synchronous>, transform_indices = @transform_6, window_bounds = array<i64: 1, 16>}, {transform_indices = @transform_7, window_bounds = array<i64: 1, 256, 16>}]} {
    %c0_i32 = arith.constant 0 : i32
    %0 = arith.cmpi eq, %arg1, %c0_i32 : i32
    %1 = arith.extui %0 : i1 to i32
    %c0_i32_0 = arith.constant 0 : i32
    %2 = arith.cmpi ne, %1, %c0_i32_0 : i32
    scf.if %2 {
      %c0_64 = arith.constant 0 : index
      %c0_65 = arith.constant 0 : index
      %c0_66 = arith.constant 0 : index
      %c0_67 = arith.constant 0 : index
      %106 = vector.load %arg2[%c0_64, %c0_65, %c0_66, %c0_67] : memref<1x16x16x16xbf16, #tpu.memory_space<vmem>>, vector<1x16x16x16xbf16>
      %107 = vector.shape_cast %106 : vector<1x16x16x16xbf16> to vector<16x16x16xbf16>
      %108 = vector.shape_cast %107 : vector<16x16x16xbf16> to vector<256x16xbf16>
      %c0_68 = arith.constant 0 : index
      %c0_69 = arith.constant 0 : index
      %109 = vector.load %arg3[%c0_68, %c0_69] : memref<16x128xbf16, #tpu.memory_space<vmem>>, vector<16x128xbf16>
      %cst_70 = arith.constant dense<0.000000e+00> : vector<256x128xf32>
      %110 = tpu.matmul %108, %109, %cst_70 {dimension_numbers = #tpu.dot_dimension_numbers<[1], [0], [0], [1], [0, 0, 1, 1], [], []>} : vector<256x16xbf16>, vector<16x128xbf16>, vector<256x128xf32> -> vector<256x128xf32>
      %c0_71 = arith.constant 0 : index
      %c0_72 = arith.constant 0 : index
      %111 = vector.load %arg4[%c0_71, %c0_72] : memref<1x128xf32, #tpu.memory_space<vmem>>, vector<1x128xf32>
      %112 = vector.broadcast %111 : vector<1x128xf32> to vector<256x128xf32>
      %113 = arith.addf %110, %112 : vector<256x128xf32>
      %cst_73 = arith.constant 0.000000e+00 : f32
      %114 = vector.broadcast %cst_73 : f32 to vector<256x128xf32>
      %115 = arith.maximumf %113, %114 : vector<256x128xf32>
      %116 = arith.truncf %115 : vector<256x128xf32> to vector<256x128xbf16>
      %117 = vector.shape_cast %116 : vector<256x128xbf16> to vector<16x16x128xbf16>
      %c2 = arith.constant 2 : index
      %c0_74 = arith.constant 0 : index
      %c0_75 = arith.constant 0 : index
      %118 = vector.load %arg10[%c2, %c0_74, %c0_75] : memref<22x16x128xbf16, #tpu.memory_space<vmem>>, vector<16x16x128xbf16>
      tpu.vector_store %arg10[%c2, %c0_74, %c0_75], %117 {strides = array<i32>} : memref<22x16x128xbf16, #tpu.memory_space<vmem>>, vector<16x16x128xbf16>,
      %cst_76 = arith.constant 0.000000e+00 : bf16
      %119 = vector.broadcast %cst_76 : bf16 to vector<2x16x128xbf16>
      %c0_77 = arith.constant 0 : index
      %c0_78 = arith.constant 0 : index
      %c0_79 = arith.constant 0 : index
      %120 = vector.load %arg10[%c0_77, %c0_78, %c0_79] : memref<22x16x128xbf16, #tpu.memory_space<vmem>>, vector<2x16x128xbf16>
      tpu.vector_store %arg10[%c0_77, %c0_78, %c0_79], %119 {strides = array<i32>} : memref<22x16x128xbf16, #tpu.memory_space<vmem>>, vector<2x16x128xbf16>,
      %cst_80 = arith.constant 0.000000e+00 : bf16
      %121 = vector.broadcast %cst_80 : bf16 to vector<4x16x128xbf16>
      %c18 = arith.constant 18 : index
      %c0_81 = arith.constant 0 : index
      %c0_82 = arith.constant 0 : index
      %122 = vector.load %arg10[%c18, %c0_81, %c0_82] : memref<22x16x128xbf16, #tpu.memory_space<vmem>>, vector<4x16x128xbf16>
      tpu.vector_store %arg10[%c18, %c0_81, %c0_82], %121 {strides = array<i32>} : memref<22x16x128xbf16, #tpu.memory_space<vmem>>, vector<4x16x128xbf16>,
    } else {
    }
    %3 = tpu.iota {dimensions = array<i32: 1>} : vector<16x16x128xi32>
    %4 = vector.shape_cast %3 : vector<16x16x128xi32> to vector<256x128xi32>
    %c1_i32 = arith.constant 1 : i32
    %5 = vector.broadcast %c1_i32 : i32 to vector<256x128xi32>
    %6 = arith.cmpi sge, %4, %5 : vector<256x128xi32>
    %c15_i32 = arith.constant 15 : i32
    %7 = vector.broadcast %c15_i32 : i32 to vector<256x128xi32>
    %8 = arith.cmpi slt, %4, %7 : vector<256x128xi32>
    %cst = arith.constant 0.000000e+00 : bf16
    %9 = vector.broadcast %cst : bf16 to vector<256x128xbf16>
    %c16_i32 = arith.constant 16 : i32
    %10 = arith.muli %arg1, %c16_i32 : i32
    %c0_i32_1 = arith.constant 0 : i32
    %11 = arith.addi %10, %c0_i32_1 : i32
    %12 = arith.index_cast %11 : i32 to index
    %c0 = arith.constant 0 : index
    %c0_2 = arith.constant 0 : index
    %13 = vector.load %arg10[%12, %c0, %c0_2] : memref<22x16x128xbf16, #tpu.memory_space<vmem>>, vector<17x16x128xbf16>
    %14 = vector.shape_cast %13 : vector<17x16x128xbf16> to vector<272x128xbf16>
    %15 = vector.extract_strided_slice %14 {offsets = [15, 0], sizes = [256, 128], strides = [1, 1]} : vector<272x128xbf16> to vector<256x128xbf16>
    %16 = arith.select %6, %15, %9 : vector<256x128xi1>, vector<256x128xbf16>
    %c0_3 = arith.constant 0 : index
    %c0_4 = arith.constant 0 : index
    %17 = vector.load %arg11[%c0_3, %c0_4] : memref<256x1152xbf16, #tpu.memory_space<vmem>>, vector<256x128xbf16>
    tpu.vector_store %arg11[%c0_3, %c0_4], %16 {strides = array<i32>} : memref<256x1152xbf16, #tpu.memory_space<vmem>>, vector<256x128xbf16>,
    %c16_i32_5 = arith.constant 16 : i32
    %18 = arith.muli %arg1, %c16_i32_5 : i32
    %c1_i32_6 = arith.constant 1 : i32
    %19 = arith.addi %18, %c1_i32_6 : i32
    %20 = arith.index_cast %19 : i32 to index
    %c0_7 = arith.constant 0 : index
    %c0_8 = arith.constant 0 : index
    %21 = vector.load %arg10[%20, %c0_7, %c0_8] : memref<22x16x128xbf16, #tpu.memory_space<vmem>>, vector<17x16x128xbf16>
    %22 = vector.shape_cast %21 : vector<17x16x128xbf16> to vector<272x128xbf16>
    %23 = vector.extract_strided_slice %22 {offsets = [0, 0], sizes = [256, 128], strides = [1, 1]} : vector<272x128xbf16> to vector<256x128xbf16>
    %c0_9 = arith.constant 0 : index
    %c128 = arith.constant 128 : index
    %24 = vector.load %arg11[%c0_9, %c128] : memref<256x1152xbf16, #tpu.memory_space<vmem>>, vector<256x128xbf16>
    tpu.vector_store %arg11[%c0_9, %c128], %23 {strides = array<i32>} : memref<256x1152xbf16, #tpu.memory_space<vmem>>, vector<256x128xbf16>,
    %c16_i32_10 = arith.constant 16 : i32
    %25 = arith.muli %arg1, %c16_i32_10 : i32
    %c1_i32_11 = arith.constant 1 : i32
    %26 = arith.addi %25, %c1_i32_11 : i32
    %27 = arith.index_cast %26 : i32 to index
    %c0_12 = arith.constant 0 : index
    %c0_13 = arith.constant 0 : index
    %28 = vector.load %arg10[%27, %c0_12, %c0_13] : memref<22x16x128xbf16, #tpu.memory_space<vmem>>, vector<17x16x128xbf16>
    %29 = vector.shape_cast %28 : vector<17x16x128xbf16> to vector<272x128xbf16>
    %30 = vector.extract_strided_slice %29 {offsets = [1, 0], sizes = [256, 128], strides = [1, 1]} : vector<272x128xbf16> to vector<256x128xbf16>
    %31 = arith.select %8, %30, %9 : vector<256x128xi1>, vector<256x128xbf16>
    %c0_14 = arith.constant 0 : index
    %c256 = arith.constant 256 : index
    %32 = vector.load %arg11[%c0_14, %c256] : memref<256x1152xbf16, #tpu.memory_space<vmem>>, vector<256x128xbf16>
    tpu.vector_store %arg11[%c0_14, %c256], %31 {strides = array<i32>} : memref<256x1152xbf16, #tpu.memory_space<vmem>>, vector<256x128xbf16>,
    %c16_i32_15 = arith.constant 16 : i32
    %33 = arith.muli %arg1, %c16_i32_15 : i32
    %c1_i32_16 = arith.constant 1 : i32
    %34 = arith.addi %33, %c1_i32_16 : i32
    %35 = arith.index_cast %34 : i32 to index
    %c0_17 = arith.constant 0 : index
    %c0_18 = arith.constant 0 : index
    %36 = vector.load %arg10[%35, %c0_17, %c0_18] : memref<22x16x128xbf16, #tpu.memory_space<vmem>>, vector<17x16x128xbf16>
    %37 = vector.shape_cast %36 : vector<17x16x128xbf16> to vector<272x128xbf16>
    %38 = vector.extract_strided_slice %37 {offsets = [15, 0], sizes = [256, 128], strides = [1, 1]} : vector<272x128xbf16> to vector<256x128xbf16>
    %39 = arith.select %6, %38, %9 : vector<256x128xi1>, vector<256x128xbf16>
    %c0_19 = arith.constant 0 : index
    %c384 = arith.constant 384 : index
    %40 = vector.load %arg11[%c0_19, %c384] : memref<256x1152xbf16, #tpu.memory_space<vmem>>, vector<256x128xbf16>
    tpu.vector_store %arg11[%c0_19, %c384], %39 {strides = array<i32>} : memref<256x1152xbf16, #tpu.memory_space<vmem>>, vector<256x128xbf16>,
    %c16_i32_20 = arith.constant 16 : i32
    %41 = arith.muli %arg1, %c16_i32_20 : i32
    %c2_i32 = arith.constant 2 : i32
    %42 = arith.addi %41, %c2_i32 : i32
    %43 = arith.index_cast %42 : i32 to index
    %c0_21 = arith.constant 0 : index
    %c0_22 = arith.constant 0 : index
    %44 = vector.load %arg10[%43, %c0_21, %c0_22] : memref<22x16x128xbf16, #tpu.memory_space<vmem>>, vector<17x16x128xbf16>
    %45 = vector.shape_cast %44 : vector<17x16x128xbf16> to vector<272x128xbf16>
    %46 = vector.extract_strided_slice %45 {offsets = [0, 0], sizes = [256, 128], strides = [1, 1]} : vector<272x128xbf16> to vector<256x128xbf16>
    %c0_23 = arith.constant 0 : index
    %c512 = arith.constant 512 : index
    %47 = vector.load %arg11[%c0_23, %c512] : memref<256x1152xbf16, #tpu.memory_space<vmem>>, vector<256x128xbf16>
    tpu.vector_store %arg11[%c0_23, %c512], %46 {strides = array<i32>} : memref<256x1152xbf16, #tpu.memory_space<vmem>>, vector<256x128xbf16>,
    %c16_i32_24 = arith.constant 16 : i32
    %48 = arith.muli %arg1, %c16_i32_24 : i32
    %c2_i32_25 = arith.constant 2 : i32
    %49 = arith.addi %48, %c2_i32_25 : i32
    %50 = arith.index_cast %49 : i32 to index
    %c0_26 = arith.constant 0 : index
    %c0_27 = arith.constant 0 : index
    %51 = vector.load %arg10[%50, %c0_26, %c0_27] : memref<22x16x128xbf16, #tpu.memory_space<vmem>>, vector<17x16x128xbf16>
    %52 = vector.shape_cast %51 : vector<17x16x128xbf16> to vector<272x128xbf16>
    %53 = vector.extract_strided_slice %52 {offsets = [1, 0], sizes = [256, 128], strides = [1, 1]} : vector<272x128xbf16> to vector<256x128xbf16>
    %54 = arith.select %8, %53, %9 : vector<256x128xi1>, vector<256x128xbf16>
    %c0_28 = arith.constant 0 : index
    %c640 = arith.constant 640 : index
    %55 = vector.load %arg11[%c0_28, %c640] : memref<256x1152xbf16, #tpu.memory_space<vmem>>, vector<256x128xbf16>
    tpu.vector_store %arg11[%c0_28, %c640], %54 {strides = array<i32>} : memref<256x1152xbf16, #tpu.memory_space<vmem>>, vector<256x128xbf16>,
    %c16_i32_29 = arith.constant 16 : i32
    %56 = arith.muli %arg1, %c16_i32_29 : i32
    %c2_i32_30 = arith.constant 2 : i32
    %57 = arith.addi %56, %c2_i32_30 : i32
    %58 = arith.index_cast %57 : i32 to index
    %c0_31 = arith.constant 0 : index
    %c0_32 = arith.constant 0 : index
    %59 = vector.load %arg10[%58, %c0_31, %c0_32] : memref<22x16x128xbf16, #tpu.memory_space<vmem>>, vector<17x16x128xbf16>
    %60 = vector.shape_cast %59 : vector<17x16x128xbf16> to vector<272x128xbf16>
    %61 = vector.extract_strided_slice %60 {offsets = [15, 0], sizes = [256, 128], strides = [1, 1]} : vector<272x128xbf16> to vector<256x128xbf16>
    %62 = arith.select %6, %61, %9 : vector<256x128xi1>, vector<256x128xbf16>
    %c0_33 = arith.constant 0 : index
    %c768 = arith.constant 768 : index
    %63 = vector.load %arg11[%c0_33, %c768] : memref<256x1152xbf16, #tpu.memory_space<vmem>>, vector<256x128xbf16>
    tpu.vector_store %arg11[%c0_33, %c768], %62 {strides = array<i32>} : memref<256x1152xbf16, #tpu.memory_space<vmem>>, vector<256x128xbf16>,
    %c16_i32_34 = arith.constant 16 : i32
    %64 = arith.muli %arg1, %c16_i32_34 : i32
    %c3_i32 = arith.constant 3 : i32
    %65 = arith.addi %64, %c3_i32 : i32
    %66 = arith.index_cast %65 : i32 to index
    %c0_35 = arith.constant 0 : index
    %c0_36 = arith.constant 0 : index
    %67 = vector.load %arg10[%66, %c0_35, %c0_36] : memref<22x16x128xbf16, #tpu.memory_space<vmem>>, vector<17x16x128xbf16>
    %68 = vector.shape_cast %67 : vector<17x16x128xbf16> to vector<272x128xbf16>
    %69 = vector.extract_strided_slice %68 {offsets = [0, 0], sizes = [256, 128], strides = [1, 1]} : vector<272x128xbf16> to vector<256x128xbf16>
    %c0_37 = arith.constant 0 : index
    %c896 = arith.constant 896 : index
    %70 = vector.load %arg11[%c0_37, %c896] : memref<256x1152xbf16, #tpu.memory_space<vmem>>, vector<256x128xbf16>
    tpu.vector_store %arg11[%c0_37, %c896], %69 {strides = array<i32>} : memref<256x1152xbf16, #tpu.memory_space<vmem>>, vector<256x128xbf16>,
    %c16_i32_38 = arith.constant 16 : i32
    %71 = arith.muli %arg1, %c16_i32_38 : i32
    %c3_i32_39 = arith.constant 3 : i32
    %72 = arith.addi %71, %c3_i32_39 : i32
    %73 = arith.index_cast %72 : i32 to index
    %c0_40 = arith.constant 0 : index
    %c0_41 = arith.constant 0 : index
    %74 = vector.load %arg10[%73, %c0_40, %c0_41] : memref<22x16x128xbf16, #tpu.memory_space<vmem>>, vector<17x16x128xbf16>
    %75 = vector.shape_cast %74 : vector<17x16x128xbf16> to vector<272x128xbf16>
    %76 = vector.extract_strided_slice %75 {offsets = [1, 0], sizes = [256, 128], strides = [1, 1]} : vector<272x128xbf16> to vector<256x128xbf16>
    %77 = arith.select %8, %76, %9 : vector<256x128xi1>, vector<256x128xbf16>
    %c0_42 = arith.constant 0 : index
    %c1024 = arith.constant 1024 : index
    %78 = vector.load %arg11[%c0_42, %c1024] : memref<256x1152xbf16, #tpu.memory_space<vmem>>, vector<256x128xbf16>
    tpu.vector_store %arg11[%c0_42, %c1024], %77 {strides = array<i32>} : memref<256x1152xbf16, #tpu.memory_space<vmem>>, vector<256x128xbf16>,
    %c0_43 = arith.constant 0 : index
    %c0_44 = arith.constant 0 : index
    %79 = vector.load %arg11[%c0_43, %c0_44] : memref<256x1152xbf16, #tpu.memory_space<vmem>>, vector<256x1152xbf16>
    %c0_45 = arith.constant 0 : index
    %c0_46 = arith.constant 0 : index
    %80 = vector.load %arg5[%c0_45, %c0_46] : memref<1152x128xbf16, #tpu.memory_space<vmem>>, vector<1152x128xbf16>
    %cst_47 = arith.constant dense<0.000000e+00> : vector<256x128xf32>
    %81 = tpu.matmul %79, %80, %cst_47 {dimension_numbers = #tpu.dot_dimension_numbers<[1], [0], [0], [1], [0, 0, 1, 1], [], []>} : vector<256x1152xbf16>, vector<1152x128xbf16>, vector<256x128xf32> -> vector<256x128xf32>
    %c0_48 = arith.constant 0 : index
    %c0_49 = arith.constant 0 : index
    %82 = vector.load %arg6[%c0_48, %c0_49] : memref<1x128xf32, #tpu.memory_space<vmem>>, vector<1x128xf32>
    %83 = vector.broadcast %82 : vector<1x128xf32> to vector<256x128xf32>
    %84 = arith.addf %81, %83 : vector<256x128xf32>
    %cst_50 = arith.constant 0.000000e+00 : f32
    %85 = vector.broadcast %cst_50 : f32 to vector<256x128xf32>
    %86 = arith.maximumf %84, %85 : vector<256x128xf32>
    %87 = arith.truncf %86 : vector<256x128xf32> to vector<256x128xbf16>
    %c16_i32_51 = arith.constant 16 : i32
    %88 = arith.muli %arg1, %c16_i32_51 : i32
    %c0_52 = arith.constant 0 : index
    %89 = arith.index_cast %88 : i32 to index
    %c0_53 = arith.constant 0 : index
    %c0_54 = arith.constant 0 : index
    %90 = vector.load %arg2[%c0_52, %89, %c0_53, %c0_54] : memref<1x16x16x16xbf16, #tpu.memory_space<vmem>>, vector<1x16x16x16xbf16>
    %91 = vector.shape_cast %90 : vector<1x16x16x16xbf16> to vector<16x16x16xbf16>
    %92 = vector.shape_cast %91 : vector<16x16x16xbf16> to vector<256x16xbf16>
    %c0_55 = arith.constant 0 : index
    %c0_56 = arith.constant 0 : index
    %93 = vector.load %arg7[%c0_55, %c0_56] : memref<128x16xbf16, #tpu.memory_space<vmem>>, vector<128x16xbf16>
    %cst_57 = arith.constant dense<0.000000e+00> : vector<256x16xf32>
    %94 = tpu.matmul %87, %93, %cst_57 {dimension_numbers = #tpu.dot_dimension_numbers<[1], [0], [0], [1], [0, 0, 1, 1], [], []>} : vector<256x128xbf16>, vector<128x16xbf16>, vector<256x16xf32> -> vector<256x16xf32>
    %c0_58 = arith.constant 0 : index
    %c0_59 = arith.constant 0 : index
    %95 = vector.load %arg8[%c0_58, %c0_59] : memref<1x16xf32, #tpu.memory_space<vmem>>, vector<1x16xf32>
    %96 = vector.broadcast %95 : vector<1x16xf32> to vector<256x16xf32>
    %97 = arith.addf %94, %96 : vector<256x16xf32>
    %98 = arith.extf %92 : vector<256x16xbf16> to vector<256x16xf32>
    %99 = arith.addf %97, %98 : vector<256x16xf32>
    %cst_60 = arith.constant 0.000000e+00 : f32
    %100 = vector.broadcast %cst_60 : f32 to vector<256x16xf32>
    %101 = arith.maximumf %99, %100 : vector<256x16xf32>
    %102 = arith.truncf %101 : vector<256x16xf32> to vector<256x16xbf16>
    %c0_61 = arith.constant 0 : index
    %c0_62 = arith.constant 0 : index
    %c0_63 = arith.constant 0 : index
    %103 = vector.load %arg9[%c0_61, %c0_62, %c0_63] : memref<1x256x16xbf16, #tpu.memory_space<vmem>>, vector<1x256x16xbf16>
    %104 = vector.shape_cast %103 : vector<1x256x16xbf16> to vector<256x16xbf16>
    %105 = vector.shape_cast %102 : vector<256x16xbf16> to vector<1x256x16xbf16>
    tpu.vector_store %arg9[%c0_61, %c0_62, %c0_63], %105 {strides = array<i32>} : memref<1x256x16xbf16, #tpu.memory_space<vmem>>, vector<1x256x16xbf16>,
    return
  }
  func.func @transform_0(%arg0: i32, %arg1: i32) -> (i32, i32, i32, i32) {
    %c0_i32 = arith.constant 0 : i32
    %c0_i32_0 = arith.constant 0 : i32
    %c0_i32_1 = arith.constant 0 : i32
    %c0_i32_2 = arith.constant 0 : i32
    return %arg0, %c0_i32, %c0_i32_0, %c0_i32_1 : i32, i32, i32, i32
  }
  func.func @transform_1(%arg0: i32, %arg1: i32) -> (i32, i32) {
    %c0_i32 = arith.constant 0 : i32
    %c0_i32_0 = arith.constant 0 : i32
    %c0_i32_1 = arith.constant 0 : i32
    return %c0_i32, %c0_i32_0 : i32, i32
  }
  func.func @transform_2(%arg0: i32, %arg1: i32) -> (i32, i32) {
    %c0_i32 = arith.constant 0 : i32
    %c0_i32_0 = arith.constant 0 : i32
    %c0_i32_1 = arith.constant 0 : i32
    return %c0_i32, %c0_i32_0 : i32, i32
  }
  func.func @transform_3(%arg0: i32, %arg1: i32) -> (i32, i32) {
    %c0_i32 = arith.constant 0 : i32
    %c0_i32_0 = arith.constant 0 : i32
    %c0_i32_1 = arith.constant 0 : i32
    return %c0_i32, %c0_i32_0 : i32, i32
  }
  func.func @transform_4(%arg0: i32, %arg1: i32) -> (i32, i32) {
    %c0_i32 = arith.constant 0 : i32
    %c0_i32_0 = arith.constant 0 : i32
    %c0_i32_1 = arith.constant 0 : i32
    return %c0_i32, %c0_i32_0 : i32, i32
  }
  func.func @transform_5(%arg0: i32, %arg1: i32) -> (i32, i32) {
    %c0_i32 = arith.constant 0 : i32
    %c0_i32_0 = arith.constant 0 : i32
    %c0_i32_1 = arith.constant 0 : i32
    return %c0_i32, %c0_i32_0 : i32, i32
  }
  func.func @transform_6(%arg0: i32, %arg1: i32) -> (i32, i32) {
    %c0_i32 = arith.constant 0 : i32
    %c0_i32_0 = arith.constant 0 : i32
    %c0_i32_1 = arith.constant 0 : i32
    return %c0_i32, %c0_i32_0 : i32, i32
  }
  func.func @transform_7(%arg0: i32, %arg1: i32) -> (i32, i32, i32) {
    %c0_i32 = arith.constant 0 : i32
    %c0_i32_0 = arith.constant 0 : i32
    return %arg0, %arg1, %c0_i32 : i32, i32, i32
  }
}

</mosaic_0001>

<bundles_post_ra>
// kernel: bottleneck_forward.1
= control target key start
LH: loop header
LB: loop body
LE: loop exit
PB: predicated region body
PF: predicated region fallthrough
CT: control target
= control target key end

     0   :  { %s5501_s24 = smov 0   ;;  %s5503_s25 = smov 0   ;;  %s6728_s0 = inlined_call_operand.vmem [shape: bf16[2,16,16,16], index: 0, kind: input, shape index: {}]   ;;  %s6729_s1 = inlined_call_operand.vmem [shape: bf16[16,128], index: 1, kind: input, shape index: {}]   ;;  %s6730_s2 = inlined_call_operand.vmem [shape: f32[1,128], index: 2, kind: input, shape index: {}]   ;;  %s6731_s3 = inlined_call_operand.vmem [shape: bf16[1152,128], index: 3, kind: input, shape index: {}]   ;;  %s6732_s4 = inlined_call_operand.vmem [shape: f32[1,128], index: 4, kind: input, shape index: {}]   ;;  %s6733_s5 = inlined_call_operand.vmem [shape: bf16[128,16], index: 5, kind: input, shape index: {}]   ;;  %s6734_s6 = inlined_call_operand.vmem [shape: f32[1,16], index: 6, kind: input, shape index: {}]   ;;  %s6735_s7 = inlined_call_operand.vmem [shape: bf16[2,256,16], index: 7, kind: output, shape index: {}]  }
   0x1   :  { %s5505_s26 = smov 0  }
   0x2 LB: > { %s29_s27 = sadd.s32 1, %s5453_s25  ;;  %p4264_p0 = scmp.ge.s32.totalorder %s5457_s26, 1  ;;  %s5457_s26 = sphi %s5505_s26, %s17_s26   ;;  %s5453_s25 = sphi %s5503_s25, %s6767_s25   ;;  %s5449_s24 = sphi %s5501_s24, %s6766_s24  }
   0x3   : > { %p31_p1 = scmp.ge.s32.totalorder %s29_s27, 2  ;;  %p251_p2 = scmp.lt.s32.totalorder %s5457_s26, 3 }
   0x5   : > { %s6769_s27 = smov (%p31_p1, %s29_s27), 0  ;;  %p252_p3 = pnand %p4264_p0, %p251_p2 }
   0x7   : > { %255 = sbr.rel (%p252_p3) target bundleno = 1000 (0x3e8), region = 48 }
   0xe   : > { %v5338_v0 = vld [vmem:[%s6729_s1] sm:$0xff]   ;;  %p287_p4 = scmp.lt.s32.totalorder %s5449_s24, 1  ;;  %vm436_vm0 = vcmask 130048   ;;  %v5357_v9 = vld [vmem:[%s6731_s3 + $0x48] sm:$0xff]   ;;  %v5359_v13 = vld [vmem:[%s6731_s3 + $0x50] sm:$0xff]   ;;  %v6736_v39 = vmov 0  }
   0xf   : > { %v5355_v1 = vld [vmem:[%s6731_s3 + $0x40] sm:$0xff]   ;;  %5180 = vmatprep.subr.bf16.mxu0 %v5338_v0  ;;  %5310 = vmatprep.subr.bf16.mxu1 %v5338_v0  ;;  %v5358_v12 = vld [vmem:[%s6731_s3 + $0x8] sm:$0xff]   ;;  %v5360_v18 = vld [vmem:[%s6731_s3 + $0x10] sm:$0xff]   ;;  %v5644_v44 = vrot.slane %v6736_v39, 7  ;;  %vm5460_vm4 = vmmov 1   ;;  %vm4130_vm15 = vcmask 125952  }
  0x10   : > { %s6771_s24 = smov (!%p287_p4, %s5449_s24), 1  ;;  %5181 = vmatpush3.bf16.msra.mxu0 %v5338_v0  ;;  %5311 = vmatpush3.bf16.msra.mxu1 %v5338_v0  ;;  %v5356_v7 = vld [vmem:[%s6731_s3] sm:$0xff]   ;;  %v5361_v19 = vld [vmem:[%s6731_s3 + $0x58] sm:$0xff]   ;;  %v5366_v27 = vld [vmem:[%s6731_s3 + $0xc8] sm:$0xff]   ;;  %v718_v0 = vlaneseq  ;;  %vm752_vm7 = vsmask.f32 7424 }
  0x11   : > { %s4554_s9 = sshll.u32 %s6771_s24, 7  ;;  %4684 = vmatprep.subr.bf16.mxu1 %v5355_v1  ;;  %v5362_v20 = vld [vmem:[%s6731_s3 + $0xc0] sm:$0xff]   ;;  %v5363_v21 = vld [vmem:[%s6731_s3 + $0x18] sm:$0xff]   ;;  %v5368_v29 = vld [vmem:[%s6731_s3 + $0x88] sm:$0xff]   ;;  %6747 = vst [vmem:[#allocation4_spill] sm:$0xff] %v5644_v44 }
  0x12   : > { %s5533_s12 = scalar_lea.vmem %s6728_s0, %s4554_s9  ;;  %v5364_v22 = vld [vmem:[%s6731_s3 + $0x80] sm:$0xff]   ;;  %4796 = vmatprep.subr.bf16.mxu0 %v5362_v20  ;;  %v5369_v30 = vld [vmem:[%s6731_s3 + $0x68] sm:$0xff]   ;;  %v5370_v31 = vld [vmem:[%s6731_s3 + $0xd0] sm:$0xff]   ;;  %v719_v1 = vshrl.u32 %v718_v0, 7  ;;  %vm781_vm8 = vsmask.f32 256  ;;  %s6613_s30 = scalar_lea.vmem %s6735_s7, %s4554_s9 }
  0x13   : > { %v5339_v2 = vld [vmem:[%s5533_s12] sm:$0xff]   ;;  %v5340_v3 = vld [vmem:[%s5533_s12 + $0x8] sm:$0xff]   ;;  %v5341_v4 = vld [vmem:[%s5533_s12 + $0x10] sm:$0xff]  }
  0x14   : > { %5182 = vmatprep.mubr.msk.bf16.mxu0 %vm436_vm0, %v5339_v2  ;;  %v5342_v5 = vld [vmem:[%s5533_s12 + $0x18] sm:$0xff]   ;;  %v5343_v6 = vld [vmem:[%s5533_s12 + $0x20] sm:$0xff]   ;;  %v5348_v10 = vld [vmem:[%s5533_s12 + $0x48] sm:$0xff]   ;;  %vm721_vm1 = vcmp.ge.s32.totalorder %v719_v1, 1 }
  0x15   : > { %5183 = vmatmul.mubr.msk.bf16.vlgmr.msra.gmra.mrb[0].mxu0 %vm436_vm0, %v5340_v3  ;;  %v5347_v8 = vld [vmem:[%s5533_s12 + $0x40] sm:$0xff]   ;;  %v5349_v11 = vld [vmem:[%s5533_s12 + $0x50] sm:$0xff]   ;;  %v5344_v14 = vld [vmem:[%s5533_s12 + $0x28] sm:$0xff]   ;;  %v720_v3 = vadd.s32 8, %v719_v1 }
  0x16   : > { %5186 = vmatprep.mubr.msk.bf16.mxu0 %vm436_vm0, %v5341_v4  ;;  %5198 = vmatprep.mubr.msk.bf16.mxu1 %vm436_vm0, %v5347_v8  ;;  %v5345_v15 = vld [vmem:[%s5533_s12 + $0x30] sm:$0xff]   ;;  %v5350_v16 = vld [vmem:[%s5533_s12 + $0x58] sm:$0xff]   ;;  %v5351_v17 = vld [vmem:[%s5533_s12 + $0x60] sm:$0xff]  }
  0x17   : > { %5199 = vmatmul.mubr.msk.bf16.vlgmr.msra.gmra.mrb[0].mxu1 %vm436_vm0, %v5348_v10  ;;  %v5346_v23 = vld [vmem:[%s5533_s12 + $0x38] sm:$0xff]   ;;  %v5352_v24 = vld [vmem:[%s5533_s12 + $0x68] sm:$0xff]   ;;  %v5365_v25 = vld [vmem:[%s6731_s3 + $0x60] sm:$0xff]   ;;  %4797 = vmatpush3.bf16.msra.mxu0 %v5364_v22  ;;  %vm724_vm2 = vcmp.lt.s32.totalorder %v720_v3, 15 }
  0x18   : > { %5202 = vmatprep.mubr.msk.bf16.mxu1 %vm436_vm0, %v5349_v11  ;;  %4685 = vmatpush3.bf16.msra.mxu1 %v5356_v7  ;;  %v5353_v26 = vld [vmem:[%s5533_s12 + $0x70] sm:$0xff]   ;;  %v5367_v28 = vld [vmem:[%s6731_s3 + $0x20] sm:$0xff]   ;;  %v5371_v32 = vld [vmem:[%s6731_s3 + $0x28] sm:$0xff]  }
  0x19   : > { %4686 = vmatprep.subr.bf16.mxu1 %v5357_v9  ;;  %4798 = vmatprep.subr.bf16.mxu0 %v5366_v27  ;;  %v5372_v33 = vld [vmem:[%s6731_s3 + $0x90] sm:$0xff]   ;;  %v5354_v34 = vld [vmem:[%s5533_s12 + $0x78] sm:$0xff]   ;;  %v5378_v41 = vld [vmem:[%s6731_s3 + $0xe0] sm:$0xff]  }
  0x1a   : > { %v5373_v35 = vld [vmem:[%s6731_s3 + $0x70] sm:$0xff]   ;;  %v5374_v36 = vld [vmem:[%s6731_s3 + $0xd8] sm:$0xff]   ;;  %v5380_v43 = vld [vmem:[%s6731_s3 + $0xa0] sm:$0xff]  }
  0x1b   : > { %4799 = vmatpush3.bf16.msra.mxu0 %v5368_v29  ;;  %v5375_v37 = vld [vmem:[%s6731_s3 + $0x30] sm:$0xff]   ;;  %v5376_v38 = vld [vmem:[%s6731_s3 + $0x98] sm:$0xff]   ;;  %v5381_v45 = vld [vmem:[%s6731_s3 + $0xe8] sm:$0xff]  }
  0x1c   : > { %4687 = vmatpush3.bf16.msra.mxu1 %v5358_v12  ;;  %4800 = vmatprep.subr.bf16.mxu0 %v5370_v31  ;;  %v5377_v40 = vld [vmem:[%s6731_s3 + $0x78] sm:$0xff]   ;;  %v5382_v46 = vld [vmem:[%s6731_s3 + $0xa8] sm:$0xff]   ;;  %v5385_v47 = vld [vmem:[%s6731_s3 + $0xf0] sm:$0xff]  }
  0x1d   : > { %5187 = vmatmul.mubr.msk.bf16.gmra.mrb[4].mxu0 %vm436_vm0, %v5342_v5  ;;  %4688 = vmatprep.subr.bf16.mxu1 %v5359_v13  ;;  %v5379_v42 = vld [vmem:[%s6731_s3 + $0x38] sm:$0xff]   ;;  %v5386_v48 = vld [vmem:[%s6731_s3 + $0xb0] sm:$0xff]   ;;  %v5383_v49 = vld [vmem:[%s6731_s3 + $0x140] sm:$0xff]  }
  0x1e   : > { %5190 = vmatprep.mubr.msk.bf16.mxu0 %vm436_vm0, %v5343_v6  ;;  %v5387_v50 = vld [vmem:[%s6731_s3 + $0xf8] sm:$0xff]   ;;  %v5384_v52 = vld [vmem:[%s6731_s3 + $0x100] sm:$0xff]   ;;  %v5389_v53 = vld [vmem:[%s6731_s3 + $0x148] sm:$0xff]  }
  0x1f   : > { %5203 = vmatmul.mubr.msk.bf16.gmra.mrb[4].mxu1 %vm436_vm0, %v5350_v16  ;;  %4801 = vmatpush3.bf16.msra.mxu0 %v5372_v33  ;;  %v5388_v51 = vld [vmem:[%s6731_s3 + $0xb8] sm:$0xff]   ;;  %v5390_v54 = vld [vmem:[%s6731_s3 + $0x108] sm:$0xff]   ;;  %v5391_v55 = vld [vmem:[%s6731_s3 + $0x150] sm:$0xff]  }
  0x20   : > { %5206 = vmatprep.mubr.msk.bf16.mxu1 %vm436_vm0, %v5351_v17  ;;  %4689 = vmatpush3.bf16.msra.mxu1 %v5360_v18  ;;  %v5392_v56 = vld [vmem:[%s6731_s3 + $0x110] sm:$0xff]   ;;  %v5393_v57 = vld [vmem:[%s6731_s3 + $0x158] sm:$0xff]   ;;  %v5395_v59 = vld [vmem:[%s6731_s3 + $0x1c0] sm:$0xff]  }
  0x21   : > { %4690 = vmatprep.subr.bf16.mxu1 %v5361_v19  ;;  %4802 = vmatprep.subr.bf16.mxu0 %v5374_v36  ;;  %v5394_v58 = vld [vmem:[%s6731_s3 + $0x118] sm:$0xff]   ;;  %v5397_v60 = vld [vmem:[%s6731_s3 + $0x160] sm:$0xff]   ;;  %v5401_v62 = vld [vmem:[%s6731_s3 + $0x168] sm:$0xff]  }
  0x22   : > { %v5398_v61 = vld [vmem:[%s6731_s3 + $0x120] sm:$0xff]   ;;  %v5402_v63 = vld [vmem:[%s6731_s3 + $0x128] sm:$0xff]   ;;  %v5405_v2 = vld [vmem:[%s6731_s3 + $0x170] sm:$0xff]  }
  0x23   : > { %4803 = vmatpush3.bf16.msra.mxu0 %v5376_v38  ;;  %v5406_v4 = vld [vmem:[%s6731_s3 + $0x130] sm:$0xff]   ;;  %vm745_vm3 = vmpackc.low %vm721_vm1, %vm721_vm1  ;;  %v5409_v10 = vld [vmem:[%s6731_s3 + $0x178] sm:$0xff]  }
  0x24   : > { %4691 = vmatpush3.bf16.msra.mxu1 %v5363_v21  ;;  %4804 = vmatprep.subr.bf16.mxu0 %v5378_v41  ;;  %vm746_vm5 = vmpackc.low %vm5460_vm4, %vm5460_vm4  ;;  %v747_v5 = vsel %vm745_vm3, 65537, %v6736_v39  ;;  %v5410_v13 = vld [vmem:[%s6731_s3 + $0x138] sm:$0xff]   ;;  %v5726_v18 = vld [vmem:[%s6730_s2] ss:$0 sm:$0xff] }
  0x25   : > { %5191 = vmatmul.mubr.msk.bf16.gmra.mrb[8].mxu0 %vm436_vm0, %v5344_v14  ;;  %4692 = vmatprep.subr.bf16.mxu1 %v5365_v25  ;;  %vm999_vm6 = vmpackc.low %vm724_vm2, %vm724_vm2  ;;  %v748_v6 = vsel %vm746_vm5, 65537, %v6736_v39  ;;  %v5751_v33 = vld [vmem:[%s6731_s3 + $0x200] sm:$0xff]  }
  0x26   : > { %5194 = vmatprep.mubr.msk.bf16.mxu0 %vm436_vm0, %v5345_v15  ;;  %v1001_v7 = vsel %vm999_vm6, 65537, %v6736_v39  ;;  %v4303_v8 = vcombine.low %v747_v5, %v748_v6 }
  0x27   : > { %5207 = vmatmul.mubr.msk.bf16.gmra.mrb[8].mxu1 %vm436_vm0, %v5352_v24  ;;  %4805 = vmatpush3.bf16.msra.mxu0 %v5380_v43  ;;  %v4337_v9 = vcombine.low %v748_v6, %v1001_v7 }
  0x28   : > { %5210 = vmatprep.mubr.msk.bf16.mxu1 %vm436_vm0, %v5353_v26  ;;  %4693 = vmatpush3.bf16.msra.mxu1 %v5367_v28  ;;  %v754_v11 = vshll.u32 %v4303_v8, 16  ;;  %v757_v15 = vshrl.u32 %v4303_v8, 16 }
  0x29   : > { %4694 = vmatprep.subr.bf16.mxu1 %v5369_v30  ;;  %4806 = vmatprep.subr.bf16.mxu0 %v5381_v45  ;;  %v1006_v12 = vshrl.u32 %v4337_v9, 16  ;;  %v1009_v17 = vshll.u32 %v4337_v9, 16 }
  0x2a   : > { %v5719_v14 = vrot.slane %v754_v11, 1 }
  0x2b   : > { %4807 = vmatpush3.bf16.msra.mxu0 %v5382_v46  ;;  %v5721_v16 = vrot.slane %v1006_v12, 7 }
  0x2c   : > { %4695 = vmatpush3.bf16.msra.mxu1 %v5371_v32  ;;  %4808 = vmatprep.subr.bf16.mxu0 %v5385_v47  ;;  %v5729_v19 = vor.u32 %v757_v15, %v5719_v14  ;;  %vm761_vm12 = vcmp.ne.s16.totalorder %v5719_v14, 0 }
  0x2d   : > { %5195 = vmatmul.mubr.msk.bf16.gmra.mrb[12].mxu0 %vm436_vm0, %v5346_v23  ;;  %4696 = vmatprep.subr.bf16.mxu1 %v5373_v35  ;;  %v5732_v21 = vor.u32 %v1009_v17, %v5721_v16  ;;  %vm1015_vm14 = vcmp.ne.s16.totalorder %v5721_v16, 0 }
  0x2e   : > { %v5740_v28 = vsel %vm752_vm7, %v5729_v19, %v5719_v14  ;;  %vm763_vm13 = vcmp.ne.s16.totalorder %v5729_v19, 0 }
  0x2f   : > { %5211 = vmatmul.mubr.msk.bf16.gmra.mrb[12].mxu1 %vm436_vm0, %v5354_v34  ;;  %4809 = vmatpush3.bf16.msra.mxu0 %v5386_v48  ;;  %6748 = vst [vmem:[#allocation5_spill] sm:$0xff] %v5740_v28  ;;  %v5746_v30 = vsel %vm781_vm8, %v5721_v16, %v5732_v21  ;;  %vm762_vm9 = vcmp.ne.s16.totalorder %v5740_v28, 0  ;;  %vm1013_vm11 = vcmp.ne.s16.totalorder %v5732_v21, 0 }
  0x30   : > { %2818 = vmatprep.mubr.bf16.mxu1 %v6736_v39  ;;  %4697 = vmatpush3.bf16.msra.mxu1 %v5375_v37  ;;  %vm1014_vm10 = vcmp.ne.s16.totalorder %v5746_v30, 0 }
  0x31   : > { %4698 = vmatprep.subr.bf16.mxu1 %v5377_v40  ;;  %4810 = vmatprep.subr.bf16.mxu0 %v5387_v50 }
  0x33   : > { %4811 = vmatpush3.bf16.msra.mxu0 %v5388_v51 }
  0x34   : > { %4699 = vmatpush3.bf16.msra.mxu1 %v5379_v42  ;;  %5020 = vmatprep.subr.bf16.mxu0 %v5395_v59 }
  0x35   : > { %4908 = vmatprep.subr.bf16.mxu1 %v5383_v49 }
  0x37   : > { %2819 = vmatmul.mubr.bf16.vlgmr.msra.gmra.mrb[16].mxu1 %v5644_v44 }
  0x38   : > { %4909 = vmatpush3.bf16.msra.mxu1 %v5384_v52 }
  0x39   : > { %4910 = vmatprep.subr.bf16.mxu1 %v5389_v53 }
  0x3c   : > { %4911 = vmatpush3.bf16.msra.mxu1 %v5390_v54 }
  0x3d   : > { %4912 = vmatprep.subr.bf16.mxu1 %v5391_v55 }
  0x40   : > { %4913 = vmatpush3.bf16.msra.mxu1 %v5392_v56 }
  0x41   : > { %4914 = vmatprep.subr.bf16.mxu1 %v5393_v57  ;;  %v5781_v57 = vrot.slane %v6736_v39, 1 }
  0x43   : > { %6749 = vst [vmem:[#allocation6_spill] sm:$0xff] %v5781_v57 }
  0x44   : > { %4915 = vmatpush3.bf16.msra.mxu1 %v5394_v58 }
  0x45   : > { %4916 = vmatprep.subr.bf16.mxu1 %v5397_v60 }
  0x48   : > { %4917 = vmatpush3.bf16.msra.mxu1 %v5398_v61 }
  0x49   : > { %4918 = vmatprep.subr.bf16.mxu1 %v5401_v62 }
  0x4c   : > { %4919 = vmatpush3.bf16.msra.mxu1 %v5402_v63 }
  0x4d   : > { %4920 = vmatprep.subr.bf16.mxu1 %v5405_v2 }
  0x50   : > { %4921 = vmatpush3.bf16.msra.mxu1 %v5406_v4 }
  0x51   : > { %4922 = vmatprep.subr.bf16.mxu1 %v5409_v10 }
  0x54   : > { %4923 = vmatpush3.bf16.msra.mxu1 %v5410_v13  ;;  %v5396_v13 = vld [vmem:[%s6731_s3 + $0x180] sm:$0xff]  }
  0x55   : > { %5214 = vmatprep.subr.bf16.mxu1 %v5751_v33 }
  0xe8   : > { %v5184_v20 = vpop.f32.mrb[0].mxu0 }
  0xe9   : > { %v528_v22 = vadd.f32 %v5184_v20, %v5726_v18  ;;  %v519_v23 = vpop.f32.mrb[1].mxu0 }
  0xea   : > { %v520_v24 = vadd.f32 %v5726_v18, %v519_v23  ;;  %v5185_v25 = vpop.f32.mrb[2].mxu0  ;;  %v5200_v40 = vpop.f32.mrb[0].mxu1 }
  0xeb   : > { %v531_v26 = vadd.f32 %v5185_v25, %v5726_v18  ;;  %v522_v27 = vpop.f32.mrb[3].mxu0  ;;  %v648_v31 = vmax.f32 %v528_v22, 0.0  ;;  %v5765_v45 = vadd.f32 %v5200_v40, %v5726_v18  ;;  %v5767_v46 = vpop.f32.mrb[1].mxu1  ;;  %v5399_v25 = vld [vmem:[%s6731_s3 + $0x1c8] sm:$0xff]  }
  0xec   : > { %v523_v29 = vadd.f32 %v5726_v18, %v522_v27  ;;  %v646_v34 = vmax.f32 %v520_v24, 0.0  ;;  %v5777_v52 = vpop.f32.mrb[2].mxu1 }
  0xed   : > { %v649_v32 = vmax.f32 %v531_v26, 0.0  ;;  %v5783_v58 = vpop.f32.mrb[3].mxu1 }
  0xee   : > { %v647_v35 = vmax.f32 %v523_v29, 0.0 }
  0xef   : > { %v5754_v36 = vpack.c.bf16 %v649_v32, %v648_v31 }
  0xf0   : > { %v5758_v37 = vpack.c.bf16 %v647_v35, %v646_v34  ;;  %v5188_v38 = vpop.f32.mrb[4].mxu0 }
  0xf1   : > { %v544_v41 = vadd.f32 %v5188_v38, %v5726_v18  ;;  %v535_v42 = vpop.f32.mrb[5].mxu0  ;;  %v767_v43 = vsel %vm762_vm9, %v5754_v36, 0  ;;  %v5791_v5 = vsel %vm1014_vm10, %v5754_v36, 0 }
  0xf2   : > { %v536_v47 = vadd.f32 %v5726_v18, %v535_v42  ;;  %v5189_v48 = vpop.f32.mrb[6].mxu0  ;;  %2826 = vmatprep.mubr.bf16.mxu1 %v5758_v37  ;;  %v766_v49 = vsel %vm762_vm9, %v5758_v37, 0  ;;  %v1017_v50 = vsel %vm1014_vm10, %v5758_v37, 0  ;;  %v803_v51 = vshrl.u32 %v767_v43, 16  ;;  %v5800_v12 = vpop.f32.mrb[4].mxu1 }
  0xf3   : > { %v652_v53 = vmax.f32 %v544_v41, 0.0  ;;  %v547_v54 = vadd.f32 %v5189_v48, %v5726_v18  ;;  %v538_v55 = vpop.f32.mrb[7].mxu0  ;;  %v795_v56 = vshrl.u32 %v766_v49, 16  ;;  %v1041_v61 = vshll.u32 %v1017_v50, 16  ;;  %v5811_v24 = vpop.f32.mrb[5].mxu1 }
  0xf4   : > { %v650_v59 = vmax.f32 %v536_v47, 0.0  ;;  %v539_v60 = vadd.f32 %v5726_v18, %v538_v55  ;;  %v5786_v62 = vrot.slane %v803_v51, 7  ;;  %v798_v1 = vshll.u32 %v766_v49, 16  ;;  %v5827_v34 = vpop.f32.mrb[6].mxu1  ;;  %v5400_v49 = vld [vmem:[%s6731_s3 + $0x188] sm:$0xff]  }
  0xf5   : > { %v653_v63 = vmax.f32 %v547_v54, 0.0  ;;  %v797_v0 = vrot.slane %v795_v56, 7  ;;  %v806_v2 = vshll.u32 %v767_v43, 16  ;;  %v1043_v4 = vrot.slane %v1041_v61, 1  ;;  %v5831_v43 = vpop.f32.mrb[7].mxu1  ;;  %v5403_v54 = vld [vmem:[%s6731_s3 + $0x1d0] sm:$0xff]  }
  0xf6   : > { %v651_v3 = vmax.f32 %v539_v60, 0.0  ;;  %v1045_v11 = vshrl.u32 %v1017_v50, 16  ;;  %v1049_v23 = vshll.u32 %v5791_v5, 16  ;;  %v1645_v14 = vsel %vm761_vm12, %v5758_v37, 0 }
  0xf7   : > { %v5793_v6 = vpack.c.bf16 %v653_v63, %v652_v53  ;;  %v800_v7 = vor.u32 %v798_v1, %v797_v0  ;;  %v5796_v8 = vor.u32 %v806_v2, %v5786_v62  ;;  %v1044_v22 = vsel %vm752_vm7, %v5781_v57, %v1043_v4 }
  0xf8   : > { %v5798_v9 = vpack.c.bf16 %v651_v3, %v650_v59  ;;  %v5192_v10 = vpop.f32.mrb[8].mxu0  ;;  %v1047_v51 = vor.u32 %v1045_v11, %v1043_v4  ;;  %v5850_v61 = vrot.slane %v1049_v23, 1  ;;  %v5404_v3 = vld [vmem:[%s6731_s3 + $0x190] sm:$0xff]  }
  0xf9   : > { %v560_v15 = vadd.f32 %v5192_v10, %v5726_v18  ;;  %v551_v17 = vpop.f32.mrb[9].mxu0  ;;  %v801_v20 = vsel %vm781_vm8, %v5644_v44, %v800_v7  ;;  %v809_v29 = vsel %vm781_vm8, %v797_v0, %v5796_v8  ;;  %v5825_v32 = vsel %vm762_vm9, %v5793_v6, 0 }
  0xfa   : > { %v552_v26 = vadd.f32 %v5726_v18, %v551_v17  ;;  %v5193_v27 = vpop.f32.mrb[10].mxu0  ;;  %2827 = vmatmul.mubr.bf16.gmra.mrb[20].mxu1 %v801_v20  ;;  %2979 = vmatprep.mubr.bf16.mxu0 %v801_v20  ;;  %v768_v31 = vsel %vm762_vm9, %v5798_v9, 0  ;;  %v5845_v56 = vsel %vm1014_vm10, %v5798_v9, 0  ;;  %v819_v59 = vshrl.u32 %v5825_v32, 16  ;;  %v5855_v2 = vpop.f32.mrb[8].mxu1  ;;  %v5407_v17 = vld [vmem:[%s6731_s3 + $0x1d8] sm:$0xff]  }
  0xfb   : > { %v656_v35 = vmax.f32 %v560_v15, 0.0  ;;  %v563_v38 = vadd.f32 %v5193_v27, %v5726_v18  ;;  %v554_v40 = vpop.f32.mrb[11].mxu0  ;;  %2834 = vmatprep.mubr.bf16.mxu1 %v5754_v36  ;;  %2980 = vmatmul.mubr.bf16.vlgmr.msra.gmra.mrb[16].mxu0 %v1044_v22  ;;  %v811_v41 = vshrl.u32 %v768_v31, 16  ;;  %v814_v42 = vshll.u32 %v768_v31, 16  ;;  %v5866_v15 = vpop.f32.mrb[9].mxu1 }
  0xfc   : > { %v654_v47 = vmax.f32 %v552_v26, 0.0  ;;  %v555_v48 = vadd.f32 %v5726_v18, %v554_v40  ;;  %2987 = vmatprep.mubr.bf16.mxu0 %v809_v29  ;;  %5021 = vmatpush3.bf16.msra.mxu0 %v5396_v13  ;;  %v1052_v7 = vsel %vm752_vm7, %v1047_v51, %v5850_v61  ;;  %v1057_v11 = vshll.u32 %v5845_v56, 16  ;;  %v5877_v27 = vpop.f32.mrb[10].mxu1 }
  0xfd   : > { %v657_v50 = vmax.f32 %v563_v38, 0.0  ;;  %v5837_v53 = vrot.slane %v811_v41, 7  ;;  %5022 = vmatprep.subr.bf16.mxu0 %v5399_v25  ;;  %v584_v13 = vadd.f32 %v5726_v18, %v5767_v46  ;;  %v5872_v23 = vrot.slane %v819_v59, 7  ;;  %v5886_v40 = vpop.f32.mrb[11].mxu1 }
  0xfe   : > { %v655_v55 = vmax.f32 %v555_v48, 0.0  ;;  %v822_v25 = vshll.u32 %v5825_v32, 16  ;;  %v595_v26 = vadd.f32 %v5777_v52, %v5726_v18  ;;  %v664_v38 = vmax.f32 %v5765_v45, 0.0 }
  0xff   : > { %v5848_v60 = vpack.c.bf16 %v657_v50, %v656_v35  ;;  %v816_v63 = vor.u32 %v814_v42, %v5837_v53  ;;  %v1053_v41 = vshrl.u32 %v5791_v5, 16  ;;  %v662_v45 = vmax.f32 %v584_v13, 0.0  ;;  %v5411_v5 = vld [vmem:[%s6731_s3 + $0x1e0] sm:$0xff]  }
 0x100   : > { %v5853_v0 = vpack.c.bf16 %v655_v55, %v654_v47  ;;  %v5196_v1 = vpop.f32.mrb[12].mxu0  ;;  %5023 = vmatpush3.bf16.msra.mxu0 %v5400_v49  ;;  %v665_v48 = vmax.f32 %v595_v26, 0.0  ;;  %v587_v49 = vadd.f32 %v5726_v18, %v5783_v58  ;;  %v5902_v51 = vrot.slane %v1057_v11, 1 }
 0x101   : > { %v576_v4 = vadd.f32 %v5196_v1, %v5726_v18  ;;  %v567_v10 = vpop.f32.mrb[13].mxu0  ;;  %5024 = vmatprep.subr.bf16.mxu0 %v5403_v54  ;;  %v5882_v31 = vsel %vm781_vm8, %v5786_v62, %v816_v63  ;;  %v5408_v62 = vld [vmem:[%s6731_s3 + $0x198] sm:$0xff]   ;;  %v824_v54 = vor.u32 %v822_v25, %v5872_v23  ;;  %v5908_v55 = vsel %vm1014_vm10, %v5793_v6, 0 }
 0x102   : > { %2835 = vmatmul.mubr.bf16.gmra.mrb[24].mxu1 %v809_v29  ;;  %v568_v20 = vadd.f32 %v5726_v18, %v567_v10  ;;  %v5197_v22 = vpop.f32.mrb[14].mxu0  ;;  %v770_v42 = vsel %vm762_vm9, %v5853_v0, 0  ;;  %v5912_v1 = vpack.c.bf16 %v665_v48, %v664_v38  ;;  %v663_v58 = vmax.f32 %v587_v49, 0.0  ;;  %v5412_v10 = vld [vmem:[%s6731_s3 + $0x1a0] sm:$0xff]  }
 0x103   : > { %v660_v46 = vmax.f32 %v576_v4, 0.0  ;;  %2842 = vmatprep.mubr.bf16.mxu1 %v5798_v9  ;;  %2988 = vmatmul.mubr.bf16.gmra.mrb[20].mxu0 %v1052_v7  ;;  %v579_v29 = vadd.f32 %v5197_v22, %v5726_v18  ;;  %v570_v35 = vpop.f32.mrb[15].mxu0  ;;  %v827_v63 = vshrl.u32 %v770_v42, 16  ;;  %v1055_v4 = vor.u32 %v1053_v41, %v5850_v61  ;;  %v5917_v7 = vpop.f32.mrb[12].mxu1 }
 0x104   : > { %v658_v32 = vmax.f32 %v568_v20, 0.0  ;;  %2995 = vmatprep.mubr.bf16.mxu0 %v5882_v31  ;;  %v571_v52 = vadd.f32 %v5726_v18, %v570_v35  ;;  %5025 = vmatpush3.bf16.msra.mxu0 %v5404_v3  ;;  %v5922_v11 = vpack.c.bf16 %v663_v58, %v662_v45  ;;  %v608_v13 = vadd.f32 %v5800_v12, %v5726_v18  ;;  %v5413_v20 = vld [vmem:[%s6731_s3 + $0x1e8] sm:$0xff]  }
 0x105   : > { %v661_v47 = vmax.f32 %v579_v29, 0.0  ;;  %5026 = vmatprep.subr.bf16.mxu0 %v5407_v17  ;;  %v5926_v17 = vpop.f32.mrb[13].mxu1  ;;  %v5934_v22 = vsel %vm752_vm7, %v1055_v4, %v5902_v51  ;;  %v1061_v25 = vshrl.u32 %v5845_v56, 16  ;;  %v1065_v26 = vshll.u32 %v5908_v55, 16  ;;  %v5418_v4 = vld [vmem:[%s6731_s3 + $0x1f8] sm:$0xff]  }
 0x106   : > { %v659_v50 = vmax.f32 %v571_v52, 0.0  ;;  %v5944_v12 = vsel %vm781_vm8, %v5837_v53, %v824_v54  ;;  %v5946_v29 = vrot.slane %v827_v63, 7  ;;  %v830_v35 = vshll.u32 %v770_v42, 16  ;;  %v5417_v63 = vld [vmem:[%s6731_s3 + $0x1b0] sm:$0xff]  }
 0x107   : > { %v5910_v59 = vpack.c.bf16 %v661_v47, %v660_v46  ;;  %v5938_v46 = vpop.f32.mrb[14].mxu1  ;;  %v600_v38 = vadd.f32 %v5726_v18, %v5811_v24  ;;  %v771_v56 = vsel %vm762_vm9, %v5848_v60, 0  ;;  %v668_v52 = vmax.f32 %v608_v13, 0.0  ;;  %v5414_v24 = vld [vmem:[%s6731_s3 + $0x1a8] sm:$0xff]  }
 0x108   : > { %v5914_v3 = vpack.c.bf16 %v659_v50, %v658_v32  ;;  %5027 = vmatpush3.bf16.msra.mxu0 %v5408_v62  ;;  %v5950_v32 = vpop.f32.mrb[15].mxu1  ;;  %v611_v41 = vadd.f32 %v5827_v34, %v5726_v18  ;;  %v603_v53 = vadd.f32 %v5726_v18, %v5831_v43  ;;  %v5416_v62 = vld [vmem:[%s6731_s3 + $0x1f0] sm:$0xff]   ;;  %v1063_v47 = vor.u32 %v1061_v25, %v5902_v51 }
 0x109   : > { %5028 = vmatprep.subr.bf16.mxu0 %v5411_v5  ;;  %v666_v42 = vmax.f32 %v600_v38, 0.0  ;;  %v1021_v34 = vsel %vm1014_vm10, %v5853_v0, 0  ;;  %v832_v43 = vor.u32 %v830_v35, %v5946_v29  ;;  %v835_v49 = vshrl.u32 %v771_v56, 16 }
 0x10a   : > { %2843 = vmatmul.mubr.bf16.gmra.mrb[28].mxu1 %v5882_v31  ;;  %v669_v45 = vmax.f32 %v611_v41, 0.0  ;;  %v667_v48 = vmax.f32 %v603_v53, 0.0  ;;  %v1067_v5 = vrot.slane %v1065_v26, 1  ;;  %v1073_v58 = vshll.u32 %v1021_v34, 16 }
 0x10b   : > { %2850 = vmatprep.mubr.bf16.mxu1 %v5793_v6  ;;  %2996 = vmatmul.mubr.bf16.gmra.mrb[24].mxu0 %v5934_v22  ;;  %v1069_v13 = vshrl.u32 %v5908_v55, 16  ;;  %v624_v25 = vadd.f32 %v5855_v2, %v5726_v18  ;;  %v5995_v26 = vsel %vm781_vm8, %v5872_v23, %v832_v43  ;;  %v837_v35 = vrot.slane %v835_v49, 7  ;;  %v5419_v2 = vld [vmem:[%s6731_s3 + $0x1b8] sm:$0xff]  }
 0x10c   : > { %3003 = vmatprep.mubr.bf16.mxu0 %v5944_v12  ;;  %5029 = vmatpush3.bf16.msra.mxu0 %v5412_v10  ;;  %v5971_v50 = vpack.c.bf16 %v669_v45, %v668_v52  ;;  %v5973_v54 = vpack.c.bf16 %v667_v48, %v666_v42  ;;  %v5983_v10 = vsel %vm752_vm7, %v1063_v47, %v1067_v5  ;;  %v838_v38 = vshll.u32 %v771_v56, 16 }
 0x10d   : > { %5030 = vmatprep.subr.bf16.mxu0 %v5413_v20  ;;  %v772_v20 = vsel %vm762_vm9, %v5914_v3, 0  ;;  %v616_v55 = vadd.f32 %v5726_v18, %v5866_v15  ;;  %v1075_v52 = vrot.slane %v1073_v58, 1  ;;  %v672_v53 = vmax.f32 %v624_v25, 0.0 }
 0x10e   : > { %v843_v41 = vshrl.u32 %v772_v20, 16  ;;  %v627_v23 = vadd.f32 %v5877_v27, %v5726_v18  ;;  %v619_v56 = vadd.f32 %v5726_v18, %v5886_v40  ;;  %v1071_v42 = vor.u32 %v1069_v13, %v1067_v5 }
 0x10f   : > { %v840_v15 = vor.u32 %v838_v38, %v837_v35  ;;  %v1022_v48 = vsel %vm1014_vm10, %v5848_v60, 0  ;;  %v1077_v43 = vshrl.u32 %v1021_v34, 16  ;;  %v846_v49 = vshll.u32 %v772_v20, 16 }
 0x110   : > { %5031 = vmatpush3.bf16.msra.mxu0 %v5414_v24  ;;  %v670_v24 = vmax.f32 %v616_v55, 0.0  ;;  %v671_v47 = vmax.f32 %v619_v56, 0.0  ;;  %v6008_v45 = vsel %vm752_vm7, %v1071_v42, %v1075_v52  ;;  %v845_v27 = vrot.slane %v843_v41, 7 }
 0x111   : > { %5032 = vmatprep.subr.bf16.mxu0 %v5416_v62  ;;  %v673_v62 = vmax.f32 %v627_v23, 0.0  ;;  %v640_v5 = vadd.f32 %v5917_v7, %v5726_v18  ;;  %v6024_v58 = vsel %vm781_vm8, %v5946_v29, %v840_v15  ;;  %v1081_v34 = vshll.u32 %v1022_v48, 16 }
 0x112   : > { %2851 = vmatmul.mubr.bf16.gmra.mrb[32].mxu1 %v5944_v12  ;;  %v6016_v40 = vpack.c.bf16 %v671_v47, %v670_v24  ;;  %v632_v13 = vadd.f32 %v5726_v18, %v5926_v17  ;;  %v643_v7 = vadd.f32 %v5938_v46, %v5726_v18  ;;  %v1079_v25 = vor.u32 %v1077_v43, %v1075_v52 }
 0x113   : > { %2858 = vmatprep.mubr.bf16.mxu1 %v5853_v0  ;;  %3004 = vmatmul.mubr.bf16.gmra.mrb[28].mxu0 %v5983_v10  ;;  %v676_v20 = vmax.f32 %v640_v5, 0.0  ;;  %v848_v38 = vor.u32 %v846_v49, %v845_v27  ;;  %v1023_v29 = vsel %vm1014_vm10, %v5914_v3, 0  ;;  %v1083_v24 = vrot.slane %v1081_v34, 1 }
 0x114   : > { %3011 = vmatprep.mubr.bf16.mxu0 %v5995_v26  ;;  %5033 = vmatpush3.bf16.msra.mxu0 %v5417_v63  ;;  %v6014_v63 = vpack.c.bf16 %v673_v62, %v672_v53  ;;  %v677_v41 = vmax.f32 %v643_v7, 0.0  ;;  %v635_v53 = vadd.f32 %v5726_v18, %v5950_v32  ;;  %v1085_v52 = vshrl.u32 %v1022_v48, 16 }
 0x115   : > { %5034 = vmatprep.subr.bf16.mxu0 %v5418_v4  ;;  %v773_v4 = vsel %vm762_vm9, %v5910_v59, 0  ;;  %v6043_v46 = vsel %vm752_vm7, %v1079_v25, %v1083_v24  ;;  %v1089_v56 = vshll.u32 %v1023_v29, 16  ;;  %v6048_v42 = vsel %vm781_vm8, %v837_v35, %v848_v38 }
 0x116   : > { %6750 = vst [vmem:[#allocation7_spill] sm:$0xff] %v6014_v63  ;;  %v851_v55 = vshrl.u32 %v773_v4, 16  ;;  %v6039_v23 = vpack.c.bf16 %v677_v41, %v676_v20  ;;  %v675_v17 = vmax.f32 %v635_v53, 0.0  ;;  %v854_v18 = vshll.u32 %v773_v4, 16 }
 0x117   : > { %v774_v62 = vsel %vm762_vm9, %v5922_v11, 0  ;;  %v1087_v47 = vor.u32 %v1085_v52, %v1083_v24  ;;  %v1091_v48 = vrot.slane %v1089_v56, 1  ;;  %v1024_v5 = vsel %vm1014_vm10, %v5910_v59, 0 }
 0x118   : > { %5035 = vmatpush3.bf16.msra.mxu0 %v5419_v2  ;;  %v674_v2 = vmax.f32 %v632_v13, 0.0  ;;  %v853_v15 = vrot.slane %v851_v55, 7  ;;  %v859_v49 = vshrl.u32 %v774_v62, 16  ;;  %v1093_v34 = vshrl.u32 %v1023_v29, 16 }
 0x119   : > { %v6061_v35 = vsel %vm752_vm7, %v1087_v47, %v1091_v48  ;;  %v862_v20 = vshll.u32 %v774_v62, 16  ;;  %v1097_v7 = vshll.u32 %v1024_v5, 16  ;;  %v775_v25 = vsel %vm762_vm9, %v5912_v1, 0 }
 0x11a   : > { %2859 = vmatmul.mubr.bf16.gmra.mrb[36].mxu1 %v5995_v26  ;;  %v6050_v32 = vpack.c.bf16 %v675_v17, %v674_v2  ;;  %v856_v43 = vor.u32 %v854_v18, %v853_v15  ;;  %v861_v13 = vrot.slane %v859_v49, 7  ;;  %v1095_v38 = vor.u32 %v1093_v34, %v1091_v48 }
 0x11b   : > { %2866 = vmatprep.mubr.bf16.mxu1 %v5848_v60  ;;  %3012 = vmatmul.mubr.bf16.gmra.mrb[32].mxu0 %v6008_v45  ;;  %v1447_v29 = vsel %vm1013_vm11, %v5758_v37, 0  ;;  %v867_v2 = vshrl.u32 %v775_v25, 16  ;;  %v1099_v53 = vrot.slane %v1097_v7, 1  ;;  %v1101_v56 = vshrl.u32 %v1024_v5, 16 }
 0x11c   : > { %3019 = vmatprep.mubr.bf16.mxu0 %v6024_v58  ;;  %6751 = vst [vmem:[#allocation8_spill] sm:$0xff] %v6050_v32  ;;  %v6066_v4 = vsel %vm781_vm8, %v845_v27, %v856_v43  ;;  %v864_v55 = vor.u32 %v862_v20, %v861_v13  ;;  %v1025_v27 = vsel %vm1014_vm10, %v5922_v11, 0  ;;  %v1467_v41 = vshll.u32 %v1447_v29, 16 }
 0x11d   : > { %v1465_v24 = vshrl.u32 %v1447_v29, 16  ;;  %v6082_v52 = vsel %vm752_vm7, %v1095_v38, %v1099_v53  ;;  %v1105_v18 = vshll.u32 %v1025_v27, 16  ;;  %v870_v62 = vshll.u32 %v775_v25, 16  ;;  %v6758_v30 = vld [vmem:[#allocation7_spill] sm:$0xff] }
 0x11e   : > { %v1469_v17 = vrot.slane %v1467_v41, 1  ;;  %v6087_v47 = vsel %vm781_vm8, %v853_v15, %v864_v55  ;;  %v869_v48 = vrot.slane %v867_v2, 7  ;;  %v776_v49 = vsel %vm762_vm9, %v5973_v54, 0 }
 0x11f   : > { %v1663_v5 = vshrl.u32 %v1645_v14, 16  ;;  %v1103_v20 = vor.u32 %v1101_v56, %v1099_v53  ;;  %v1107_v7 = vrot.slane %v1105_v18, 1  ;;  %v875_v38 = vshrl.u32 %v776_v49, 16 }
 0x120   : > { %v1470_v43 = vor.u32 %v1469_v17, %v1465_v24  ;;  %v872_v15 = vor.u32 %v870_v62, %v869_v48  ;;  %v1878_v29 = vsel %vm1013_vm11, %v5754_v36, 0  ;;  %v1026_v41 = vsel %vm1014_vm10, %v5912_v1, 0 }
 0x121   : > { %v1665_v25 = vrot.slane %v1663_v5, 7  ;;  %v1898_v2 = vshll.u32 %v1878_v29, 16  ;;  %v1109_v53 = vshrl.u32 %v1025_v27, 16  ;;  %v1896_v24 = vshrl.u32 %v1878_v29, 16  ;;  %v4700_v29 = vpop.f32.mrb[16].mxu1 }
 0x122   : > { %2867 = vmatmul.mubr.bf16.gmra.mrb[40].mxu1 %v6024_v58  ;;  %v6096_v34 = vsel %vm752_vm7, %v1470_v43, %v5850_v61  ;;  %v6110_v61 = vsel %vm752_vm7, %v1103_v20, %v1107_v7  ;;  %v6115_v21 = vsel %vm781_vm8, %v861_v13, %v872_v15  ;;  %v878_v56 = vshll.u32 %v776_v49, 16 }
 0x123   : > { %2874 = vmatprep.mubr.bf16.mxu1 %v5914_v3  ;;  %3020 = vmatmul.mubr.bf16.gmra.mrb[36].mxu0 %v6043_v46  ;;  %v6103_v55 = vsel %vm781_vm8, %v1665_v25, %v5796_v8  ;;  %v1900_v17 = vrot.slane %v1898_v2, 1  ;;  %v877_v8 = vrot.slane %v875_v38, 7  ;;  %v1113_v18 = vshll.u32 %v1026_v41, 16 }
 0x124   : > { %3027 = vmatprep.mubr.bf16.mxu0 %v6048_v42  ;;  %v777_v62 = vsel %vm762_vm9, %v5971_v50, 0  ;;  %v1111_v27 = vor.u32 %v1109_v53, %v1107_v7  ;;  %v1027_v13 = vsel %vm1014_vm10, %v5973_v54, 0  ;;  %v1117_v15 = vshrl.u32 %v1026_v41, 16  ;;  %v4701_v53 = vpop.f32.mrb[17].mxu1 }
 0x125   : > { %v1901_v43 = vor.u32 %v1900_v17, %v1896_v24  ;;  %v880_v5 = vor.u32 %v878_v56, %v877_v8  ;;  %v883_v20 = vshrl.u32 %v777_v62, 16  ;;  %v1115_v49 = vrot.slane %v1113_v18, 1  ;;  %v4703_v41 = vpop.f32.mrb[18].mxu1 }
 0x126   : > { %v1121_v38 = vshll.u32 %v1027_v13, 16  ;;  %v886_v2 = vshll.u32 %v777_v62, 16  ;;  %v778_v24 = vsel %vm762_vm9, %v6016_v40, 0  ;;  %v6141_v17 = vadd.f32 %v4701_v53, %v4700_v29  ;;  %v4704_v56 = vpop.f32.mrb[19].mxu1 }
 0x127   : > { %v6123_v14 = vsel %vm752_vm7, %v1901_v43, %v5902_v51  ;;  %v6130_v25 = vsel %vm752_vm7, %v1111_v27, %v1115_v49  ;;  %v6135_v51 = vsel %vm781_vm8, %v869_v48, %v880_v5  ;;  %v885_v7 = vrot.slane %v883_v20, 7 }
 0x128   : > { %6752 = vst [vmem:[#allocation9_spill] sm:$0xff] %v6123_v14  ;;  %v1119_v18 = vor.u32 %v1117_v15, %v1115_v49  ;;  %v1123_v43 = vrot.slane %v1121_v38, 1  ;;  %v6143_v27 = vadd.f32 %v4704_v56, %v4703_v41  ;;  %v891_v48 = vshrl.u32 %v778_v24, 16 }
 0x129   : > { %v888_v39 = vor.u32 %v886_v2, %v885_v7  ;;  %v1028_v62 = vsel %vm1014_vm10, %v5971_v50, 0  ;;  %v1125_v20 = vshrl.u32 %v1027_v13, 16  ;;  %v894_v38 = vshll.u32 %v778_v24, 16 }
 0x12a   : > { %2875 = vmatmul.mubr.bf16.gmra.mrb[44].mxu1 %v6048_v42  ;;  %6753 = vst [vmem:[#allocation10_spill] sm:$0xff] %v6143_v27  ;;  %v6150_v5 = vsel %vm752_vm7, %v1119_v18, %v1123_v43  ;;  %v893_v15 = vrot.slane %v891_v48, 7  ;;  %v1129_v29 = vshll.u32 %v1028_v62, 16  ;;  %v779_v2 = vsel %vm762_vm9, %v6014_v63, 0 }
 0x12b   : > { %2882 = vmatprep.mubr.bf16.mxu1 %v5910_v59  ;;  %3028 = vmatmul.mubr.bf16.gmra.mrb[40].mxu0 %v6061_v35  ;;  %v6155_v49 = vsel %vm781_vm8, %v877_v8, %v888_v39  ;;  %v1127_v53 = vor.u32 %v1125_v20, %v1123_v43  ;;  %v1029_v13 = vsel %vm1014_vm10, %v6016_v40, 0  ;;  %v899_v56 = vshrl.u32 %v779_v2, 16 }
 0x12c   : > { %3035 = vmatprep.mubr.bf16.mxu0 %v6066_v4  ;;  %v896_v41 = vor.u32 %v894_v38, %v893_v15  ;;  %v1131_v18 = vrot.slane %v1129_v29, 1  ;;  %v1133_v8 = vshrl.u32 %v1028_v62, 16  ;;  %v1137_v24 = vshll.u32 %v1029_v13, 16 }
 0x12d   : > { %v901_v48 = vrot.slane %v899_v56, 7  ;;  %v902_v20 = vshll.u32 %v779_v2, 16  ;;  %v1229_v38 = vsel %vm762_vm9, %v6050_v32, 0  ;;  %v1030_v14 = vsel %vm1014_vm10, %v6014_v63, 0 }
 0x12e   : > { %v6166_v39 = vsel %vm752_vm7, %v1127_v53, %v1131_v18  ;;  %v6171_v43 = vsel %vm781_vm8, %v885_v7, %v896_v41  ;;  %v1135_v29 = vor.u32 %v1133_v8, %v1131_v18  ;;  %v1139_v53 = vrot.slane %v1137_v24, 1 }
 0x12f   : > { %6754 = vst [vmem:[#allocation11_spill] sm:$0xff] %v6171_v43  ;;  %v904_v44 = vor.u32 %v902_v20, %v901_v48  ;;  %v1348_v62 = vshrl.u32 %v1229_v38, 16  ;;  %v1141_v2 = vshrl.u32 %v1029_v13, 16  ;;  %v780_v41 = vsel %vm763_vm13, %v6050_v32, 0 }
 0x130   : > { %v6183_v7 = vsel %vm752_vm7, %v1135_v29, %v1139_v53  ;;  %v1351_v18 = vshll.u32 %v1229_v38, 16  ;;  %v1145_v8 = vshll.u32 %v1030_v14, 16  ;;  %v1230_v24 = vsel %vm763_vm13, %v6039_v23, 0 }
 0x131   : > { %v6189_v56 = vsel %vm781_vm8, %v893_v15, %v904_v44  ;;  %v6191_v19 = vrot.slane %v1348_v62, 7  ;;  %v907_v20 = vshrl.u32 %v780_v41, 16  ;;  %v1143_v29 = vor.u32 %v1141_v2, %v1139_v53 }
 0x132   : > { %2883 = vmatmul.mubr.bf16.gmra.mrb[48].mxu1 %v6066_v4  ;;  %6755 = vst [vmem:[#allocation12_spill] sm:$0xff] %v6189_v56  ;;  %v1031_v57 = vsel %vm1014_vm10, %v6050_v32, 0  ;;  %v1356_v28 = vshrl.u32 %v1230_v24, 16  ;;  %v910_v15 = vshll.u32 %v780_v41, 16  ;;  %v1149_v62 = vshrl.u32 %v1030_v14, 16 }
 0x133   : > { %2890 = vmatprep.mubr.bf16.mxu1 %v5922_v11  ;;  %3036 = vmatmul.mubr.bf16.gmra.mrb[44].mxu0 %v6082_v52  ;;  %v1353_v13 = vor.u32 %v1351_v18, %v6191_v19  ;;  %v909_v44 = vrot.slane %v907_v20, 7  ;;  %v1359_v18 = vshll.u32 %v1230_v24, 16  ;;  %v1032_v14 = vsel %vm1015_vm14, %v6039_v23, 0 }
 0x134   : > { %3043 = vmatprep.mubr.bf16.mxu0 %v6087_v47  ;;  %v1358_v2 = vrot.slane %v1356_v28, 7  ;;  %v1161_v27 = vshll.u32 %v1032_v14, 16 }
 0x135   : > { %v6206_v53 = vsel %vm781_vm8, %v901_v48, %v1353_v13  ;;  %v912_v41 = vor.u32 %v910_v15, %v909_v44  ;;  %v1157_v13 = vshrl.u32 %v1031_v57, 16 }
 0x13a   : > { %2891 = vmatmul.mubr.bf16.gmra.mrb[52].mxu1 %v6087_v47 }
 0x13b   : > { %2898 = vmatprep.mubr.bf16.mxu1 %v5912_v1  ;;  %3044 = vmatmul.mubr.bf16.gmra.mrb[48].mxu0 %v6110_v61 }
 0x13c   : > { %3051 = vmatprep.mubr.bf16.mxu0 %v6115_v21 }
 0x142   : > { %2899 = vmatmul.mubr.bf16.gmra.mrb[56].mxu1 %v6115_v21 }
 0x143   : > { %2906 = vmatprep.mubr.bf16.mxu1 %v5973_v54  ;;  %3052 = vmatmul.mubr.bf16.gmra.mrb[52].mxu0 %v6130_v25 }
 0x144   : > { %3059 = vmatprep.mubr.bf16.mxu0 %v6135_v51 }
 0x14a   : > { %2907 = vmatmul.mubr.bf16.gmra.mrb[60].mxu1 %v6135_v51 }
 0x14b   : > { %2914 = vmatprep.mubr.bf16.mxu1 %v5971_v50  ;;  %3060 = vmatmul.mubr.bf16.gmra.mrb[56].mxu0 %v6150_v5 }
 0x14c   : > { %3067 = vmatprep.mubr.bf16.mxu0 %v6155_v49 }
 0x152   : > { %2915 = vmatmul.mubr.bf16.gmra.mrb[64].mxu1 %v6155_v49 }
 0x153   : > { %2922 = vmatprep.mubr.bf16.mxu1 %v6016_v40  ;;  %3068 = vmatmul.mubr.bf16.gmra.mrb[60].mxu0 %v6166_v39 }
 0x154   : > { %3075 = vmatprep.mubr.bf16.mxu0 %v6171_v43 }
 0x15a   : > { %2923 = vmatmul.mubr.bf16.gmra.mrb[68].mxu1 %v6171_v43  ;;  %v1153_v43 = vshll.u32 %v1031_v57, 16 }
 0x15b   : > { %2930 = vmatprep.mubr.bf16.mxu1 %v6014_v63  ;;  %3076 = vmatmul.mubr.bf16.gmra.mrb[64].mxu0 %v6183_v7  ;;  %v1147_v63 = vrot.slane %v1145_v8, 1 }
 0x15c   : > { %3083 = vmatprep.mubr.bf16.mxu0 %v6189_v56  ;;  %v1155_v20 = vrot.slane %v1153_v43, 1  ;;  %v5420_v43 = vld [vmem:[%s6731_s3 + $0x208] sm:$0xff]  }
 0x15d   : > { %v6201_v38 = vsel %vm752_vm7, %v1143_v29, %v1147_v63  ;;  %v1151_v8 = vor.u32 %v1149_v62, %v1147_v63  ;;  %v1361_v29 = vor.u32 %v1359_v18, %v1358_v2  ;;  %v1163_v63 = vrot.slane %v1161_v27, 1 }
 0x15e   : > { %v6219_v28 = vor.u32 %v1157_v13, %v1155_v20 }
 0x15f   : > { %v1362_v16 = vsel %vm781_vm8, %v6191_v19, %v1361_v29 }
 0x160   : > { %v1164_v57 = vsel %vm752_vm7, %v6219_v28, %v1163_v63 }
 0x162   : > { %2931 = vmatmul.mubr.bf16.gmra.mrb[72].mxu1 %v6189_v56  ;;  %v913_v56 = vsel %vm781_vm8, %v901_v48, %v912_v41 }
 0x163   : > { %2938 = vmatprep.mubr.bf16.mxu1 %v6050_v32  ;;  %3084 = vmatmul.mubr.bf16.gmra.mrb[68].mxu0 %v6201_v38  ;;  %v6213_v32 = vsel %vm752_vm7, %v1151_v8, %v1155_v20 }
 0x164   : > { %3091 = vmatprep.mubr.bf16.mxu0 %v6206_v53 }
 0x16a   : > { %2939 = vmatmul.mubr.bf16.gmra.mrb[76].mxu1 %v913_v56 }
 0x16b   : > { %3092 = vmatmul.mubr.bf16.gmra.mrb[72].mxu0 %v6213_v32  ;;  %3140 = vmatprep.mubr.bf16.mxu1 %v6096_v34  ;;  %v5421_v34 = vld [vmem:[%s6731_s3 + $0x210] sm:$0xff]  }
 0x16c   : > { %3099 = vmatprep.mubr.bf16.mxu0 %v1362_v16  ;;  %v1660_v16 = vsel %vm762_vm9, %v6039_v23, 0 }
 0x172   : > { %3141 = vmatmul.mubr.bf16.vlgmr.msra.gmra.mrb[80].mxu1 %v5758_v37  ;;  %v5422_v37 = vld [vmem:[%s6731_s3 + $0x218] sm:$0xff]  }
 0x173   : > { %5215 = vmatpush3.bf16.msra.mxu1 %v5751_v33  ;;  %3100 = vmatmul.mubr.bf16.gmra.mrb[76].mxu0 %v1164_v57  ;;  %v5423_v33 = vld [vmem:[%s6731_s3 + $0x220] sm:$0xff]  }
 0x174   : > { %3148 = vmatprep.mubr.bf16.mxu1 %v5934_v22  ;;  %3301 = vmatprep.mubr.bf16.mxu0 %v5754_v36  ;;  %v5424_v22 = vld [vmem:[%s6731_s3 + $0x228] sm:$0xff]  }
 0x175   : > { %5216 = vmatprep.subr.bf16.mxu1 %v5420_v43 }
 0x177   : > { %5217 = vmatpush3.bf16.msra.mxu1 %v5420_v43 }
 0x178   : > { %5218 = vmatprep.subr.bf16.mxu1 %v5421_v34 }
 0x17a   : > { %3149 = vmatmul.mubr.bf16.gmra.mrb[84].mxu1 %v5754_v36  ;;  %v5425_v36 = vld [vmem:[%s6731_s3 + $0x230] sm:$0xff]  }
 0x17b   : > { %3156 = vmatprep.mubr.bf16.mxu1 %v5983_v10  ;;  %3302 = vmatmul.mubr.bf16.vlgmr.msra.gmra.mrb[80].mxu0 %v6103_v55  ;;  %v5426_v55 = vld [vmem:[%s6731_s3 + $0x238] sm:$0xff]  }
 0x17c   : > { %3309 = vmatprep.mubr.bf16.mxu0 %v5798_v9  ;;  %5219 = vmatpush3.bf16.msra.mxu1 %v5421_v34 }
 0x17d   : > { %5220 = vmatprep.subr.bf16.mxu1 %v5422_v37 }
 0x180   : > { %5221 = vmatpush3.bf16.msra.mxu1 %v5422_v37  ;;  %v6760_v37 = vld [vmem:[#allocation12_spill] sm:$0xff] }
 0x181   : > { %5222 = vmatprep.subr.bf16.mxu1 %v5423_v33 }
 0x182   : > { %3157 = vmatmul.mubr.bf16.gmra.mrb[88].mxu1 %v5798_v9 }
 0x183   : > { %3164 = vmatprep.mubr.bf16.mxu1 %v6008_v45  ;;  %3310 = vmatmul.mubr.bf16.gmra.mrb[84].mxu0 %v5882_v31 }
 0x184   : > { %3317 = vmatprep.mubr.bf16.mxu0 %v5793_v6  ;;  %5223 = vmatpush3.bf16.msra.mxu1 %v5423_v33 }
 0x185   : > { %5224 = vmatprep.subr.bf16.mxu1 %v5424_v22 }
 0x188   : > { %5225 = vmatpush3.bf16.msra.mxu1 %v5424_v22  ;;  %v6761_v22 = vld [vmem:[#allocation8_spill] sm:$0xff] }
 0x189   : > { %5226 = vmatprep.subr.bf16.mxu1 %v5425_v36 }
 0x18a   : > { %3165 = vmatmul.mubr.bf16.gmra.mrb[92].mxu1 %v5793_v6  ;;  %v6295_v6 = vld [vmem:[%s6732_s4] ss:$0 sm:$0xff] }
 0x18b   : > { %3172 = vmatprep.mubr.bf16.mxu1 %v6043_v46  ;;  %3318 = vmatmul.mubr.bf16.gmra.mrb[88].mxu0 %v5944_v12 }
 0x18c   : > { %3325 = vmatprep.mubr.bf16.mxu0 %v5853_v0  ;;  %5227 = vmatpush3.bf16.msra.mxu1 %v5425_v36 }
 0x18d   : > { %5228 = vmatprep.subr.bf16.mxu1 %v5426_v55 }
 0x190   : > { %5229 = vmatpush3.bf16.msra.mxu1 %v5426_v55  ;;  %v1779_v55 = vshrl.u32 %v1660_v16, 16 }
 0x192   : > { %3173 = vmatmul.mubr.bf16.gmra.mrb[96].mxu1 %v5853_v0 }
 0x193   : > { %3180 = vmatprep.mubr.bf16.mxu1 %v6061_v35  ;;  %3326 = vmatmul.mubr.bf16.gmra.mrb[92].mxu0 %v5995_v26 }
 0x194   : > { %3333 = vmatprep.mubr.bf16.mxu0 %v5848_v60 }
 0x19a   : > { %3181 = vmatmul.mubr.bf16.gmra.mrb[100].mxu1 %v5848_v60 }
 0x19b   : > { %3188 = vmatprep.mubr.bf16.mxu1 %v6082_v52  ;;  %3334 = vmatmul.mubr.bf16.gmra.mrb[96].mxu0 %v6024_v58  ;;  %v1462_v58 = vsel %vm1014_vm10, %v6039_v23, 0 }
 0x19c   : > { %3341 = vmatprep.mubr.bf16.mxu0 %v5914_v3  ;;  %v1588_v14 = vshrl.u32 %v1462_v58, 16 }
 0x1a2   : > { %3189 = vmatmul.mubr.bf16.gmra.mrb[104].mxu1 %v5914_v3  ;;  %v2821_v3 = vadd.f32 %v6141_v17, %v6295_v6  ;;  %v6757_v17 = vld [vmem:[#allocation11_spill] sm:$0xff] }
 0x1a3   : > { %3196 = vmatprep.mubr.bf16.mxu1 %v6110_v61  ;;  %3342 = vmatmul.mubr.bf16.gmra.mrb[100].mxu0 %v6048_v42  ;;  %v5427_v42 = vld [vmem:[%s6733_s5] sm:$0xff]  }
 0x1a4   : > { %3349 = vmatprep.mubr.bf16.mxu0 %v5910_v59  ;;  %5262 = vmatprep.subr.bf16.mxu0 %v5427_v42 }
 0x1a5   : > { %5263 = vmatpush3.bf16.msra.mxu0 %v5427_v42  ;;  %v5428_v42 = vld [vmem:[%s6733_s5 + $0x8] sm:$0xff]  }
 0x1a6   : > { %5264 = vmatprep.subr.bf16.mxu0 %v5428_v42 }
 0x1a9   : > { %5265 = vmatpush3.bf16.msra.mxu0 %v5428_v42 }
 0x1aa   : > { %3197 = vmatmul.mubr.bf16.gmra.mrb[108].mxu1 %v5910_v59 }
 0x1ab   : > { %3204 = vmatprep.mubr.bf16.mxu1 %v6130_v25  ;;  %3350 = vmatmul.mubr.bf16.gmra.mrb[104].mxu0 %v6066_v4  ;;  %v6756_v4 = vld [vmem:[#allocation10_spill] sm:$0xff] }
 0x1ac   : > { %3357 = vmatprep.mubr.bf16.mxu0 %v5922_v11 }
 0x1b2   : > { %3205 = vmatmul.mubr.bf16.gmra.mrb[112].mxu1 %v5922_v11 }
 0x1b3   : > { %3212 = vmatprep.mubr.bf16.mxu1 %v6150_v5  ;;  %3358 = vmatmul.mubr.bf16.gmra.mrb[108].mxu0 %v6087_v47  ;;  %v2824_v47 = vadd.f32 %v6756_v4, %v6295_v6 }
 0x1b4   : > { %3365 = vmatprep.mubr.bf16.mxu0 %v5912_v1 }
 0x1ba   : > { %3213 = vmatmul.mubr.bf16.gmra.mrb[116].mxu1 %v5912_v1 }
 0x1bb   : > { %3220 = vmatprep.mubr.bf16.mxu1 %v6166_v39  ;;  %3366 = vmatmul.mubr.bf16.gmra.mrb[112].mxu0 %v6115_v21 }
 0x1bc   : > { %3373 = vmatprep.mubr.bf16.mxu0 %v5973_v54 }
 0x1c2   : > { %3221 = vmatmul.mubr.bf16.gmra.mrb[120].mxu1 %v5973_v54 }
 0x1c3   : > { %3228 = vmatprep.mubr.bf16.mxu1 %v6183_v7  ;;  %3374 = vmatmul.mubr.bf16.gmra.mrb[116].mxu0 %v6135_v51 }
 0x1c4   : > { %3381 = vmatprep.mubr.bf16.mxu0 %v5971_v50 }
 0x1ca   : > { %3229 = vmatmul.mubr.bf16.gmra.mrb[124].mxu1 %v5971_v50 }
 0x1cb   : > { %3236 = vmatprep.mubr.bf16.mxu1 %v6201_v38  ;;  %3382 = vmatmul.mubr.bf16.gmra.mrb[120].mxu0 %v6155_v49  ;;  %v1584_v49 = vshll.u32 %v1462_v58, 16  ;;  %v1782_v58 = vshll.u32 %v1660_v16, 16 }
 0x1cc   : > { %3389 = vmatprep.mubr.bf16.mxu0 %v6016_v40 }
 0x1cd   : > { %v4706_v9 = vpop.f32.mrb[20].mxu1  ;;  %v1586_v8 = vrot.slane %v1584_v49, 1 }
 0x1ce   : > { %v4707_v60 = vpop.f32.mrb[21].mxu1  ;;  %v4812_v0 = vpop.f32.mrb[16].mxu0 }
 0x1cf   : > { %v4708_v31 = vadd.f32 %v4707_v60, %v4706_v9  ;;  %v4709_v59 = vpop.f32.mrb[22].mxu1  ;;  %v4813_v1 = vpop.f32.mrb[17].mxu0  ;;  %v6325_v34 = vsel %vm752_vm7, %v6219_v28, %v1586_v8 }
 0x1d0   : > { %v4814_v11 = vadd.f32 %v4813_v1, %v4812_v0  ;;  %v4710_v12 = vpop.f32.mrb[23].mxu1  ;;  %v4815_v50 = vpop.f32.mrb[18].mxu0  ;;  %v1590_v0 = vor.u32 %v1588_v14, %v1586_v8 }
 0x1d1   : > { %v4711_v54 = vadd.f32 %v4710_v12, %v4709_v59  ;;  %v4816_v26 = vpop.f32.mrb[19].mxu0  ;;  %v2829_v2 = vadd.f32 %v4708_v31, %v6295_v6 }
 0x1d2   : > { %v6307_v21 = vadd.f32 %v4814_v11, %v2821_v3  ;;  %v4817_v51 = vadd.f32 %v4816_v26, %v4815_v50  ;;  %3237 = vmatmul.mubr.bf16.gmra.mrb[128].mxu1 %v6016_v40  ;;  %v1781_v26 = vrot.slane %v1779_v55, 7 }
 0x1d3   : > { %3244 = vmatprep.mubr.bf16.mxu1 %v6213_v32  ;;  %3390 = vmatmul.mubr.bf16.gmra.mrb[124].mxu0 %v6757_v17  ;;  %v2832_v63 = vadd.f32 %v4711_v54, %v6295_v6  ;;  %v6762_v17 = vld [vmem:[#allocation6_spill] sm:$0xff] }
 0x1d4   : > { %v6312_v27 = vadd.f32 %v4817_v51, %v2824_v47  ;;  %3397 = vmatprep.mubr.bf16.mxu0 %v6758_v30 }
 0x1d5   : > { %v4712_v48 = vpop.f32.mrb[24].mxu1 }
 0x1d6   : > { %v4713_v56 = vpop.f32.mrb[25].mxu1  ;;  %v4818_v24 = vpop.f32.mrb[20].mxu0 }
 0x1d7   : > { %v4714_v44 = vadd.f32 %v4713_v56, %v4712_v48  ;;  %v4715_v15 = vpop.f32.mrb[26].mxu1  ;;  %v4819_v62 = vpop.f32.mrb[21].mxu0 }
 0x1d8   : > { %v4820_v40 = vadd.f32 %v4819_v62, %v4818_v24  ;;  %v4716_v18 = vpop.f32.mrb[27].mxu1  ;;  %v4821_v41 = vpop.f32.mrb[22].mxu0 }
 0x1d9   : > { %v4717_v20 = vadd.f32 %v4716_v18, %v4715_v15  ;;  %v4822_v29 = vpop.f32.mrb[23].mxu0  ;;  %v2837_v3 = vadd.f32 %v4714_v44, %v6295_v6  ;;  %v1784_v44 = vor.u32 %v1782_v58, %v1781_v26 }
 0x1da   : > { %v6320_v43 = vadd.f32 %v4820_v40, %v2829_v2  ;;  %v4823_v57 = vadd.f32 %v4822_v29, %v4821_v41  ;;  %3245 = vmatmul.mubr.bf16.gmra.mrb[132].mxu1 %v6758_v30  ;;  %v6342_v30 = vsel %vm752_vm7, %v1590_v0, %v6762_v17 }
 0x1db   : > { %3252 = vmatprep.mubr.bf16.mxu1 %v6325_v34  ;;  %3398 = vmatmul.mubr.bf16.gmra.mrb[128].mxu0 %v6760_v37  ;;  %v2840_v4 = vadd.f32 %v4717_v20, %v6295_v6  ;;  %v1785_v16 = vsel %vm781_vm8, %v6191_v19, %v1784_v44  ;;  %v6764_v37 = vmov 0  }
 0x1dc   : > { %v6329_v33 = vadd.f32 %v4823_v57, %v2832_v63  ;;  %3405 = vmatprep.mubr.bf16.mxu0 %v6761_v22  ;;  %v6763_v63 = vld [vmem:[#allocation9_spill] sm:$0xff] }
 0x1dd   : > { %v4718_v36 = vpop.f32.mrb[28].mxu1 }
 0x1de   : > { %v4719_v9 = vpop.f32.mrb[29].mxu1  ;;  %v4824_v60 = vpop.f32.mrb[24].mxu0 }
 0x1df   : > { %v4720_v31 = vadd.f32 %v4719_v9, %v4718_v36  ;;  %v4721_v59 = vpop.f32.mrb[30].mxu1  ;;  %v4825_v1 = vpop.f32.mrb[25].mxu0 }
 0x1e0   : > { %v4826_v28 = vadd.f32 %v4825_v1, %v4824_v60  ;;  %v4722_v11 = vpop.f32.mrb[31].mxu1  ;;  %v4827_v12 = vpop.f32.mrb[26].mxu0 }
 0x1e1   : > { %v4723_v50 = vadd.f32 %v4722_v11, %v4721_v59  ;;  %v4828_v54 = vpop.f32.mrb[27].mxu0  ;;  %v2845_v40 = vadd.f32 %v4720_v31, %v6295_v6 }
 0x1e2   : > { %v6337_v47 = vadd.f32 %v4826_v28, %v2837_v3  ;;  %v4829_v51 = vadd.f32 %v4828_v54, %v4827_v12  ;;  %3253 = vmatmul.mubr.bf16.gmra.mrb[136].mxu1 %v6761_v22  ;;  %v5429_v28 = vld [vmem:[%s6733_s5 + $0x10] sm:$0xff]   ;;  %v6765_v54 = vld [vmem:[#allocation4_spill] sm:$0xff] }
 0x1e3   : > { %3260 = vmatprep.mubr.bf16.mxu1 %v6342_v30  ;;  %3406 = vmatmul.mubr.bf16.gmra.mrb[132].mxu0 %v6206_v53  ;;  %v2848_v29 = vadd.f32 %v4723_v50, %v6295_v6  ;;  %v1793_v58 = vsel %vm781_vm8, %v1781_v26, %v6765_v54 }
 0x1e4   : > { %v6346_v49 = vadd.f32 %v4829_v51, %v2840_v4  ;;  %3413 = vmatprep.mubr.bf16.mxu0 %v6039_v23  ;;  %5266 = vmatprep.subr.bf16.mxu0 %v5429_v28 }
 0x1e5   : > { %v4724_v48 = vpop.f32.mrb[32].mxu1  ;;  %5267 = vmatpush3.bf16.msra.mxu0 %v5429_v28 }
 0x1e6   : > { %v4725_v56 = vpop.f32.mrb[33].mxu1  ;;  %v4830_v24 = vpop.f32.mrb[28].mxu0 }
 0x1e7   : > { %v4726_v15 = vadd.f32 %v4725_v56, %v4724_v48  ;;  %v4727_v62 = vpop.f32.mrb[34].mxu1  ;;  %v4831_v2 = vpop.f32.mrb[29].mxu0 }
 0x1e8   : > { %v4832_v18 = vadd.f32 %v4831_v2, %v4830_v24  ;;  %v4728_v41 = vpop.f32.mrb[35].mxu1  ;;  %v4833_v8 = vpop.f32.mrb[30].mxu0 }
 0x1e9   : > { %v4729_v20 = vadd.f32 %v4728_v41, %v4727_v62  ;;  %v4834_v53 = vpop.f32.mrb[31].mxu0  ;;  %v2853_v31 = vadd.f32 %v4726_v15, %v6295_v6 }
 0x1ea   : > { %v6351_v14 = vadd.f32 %v4832_v18, %v2845_v40  ;;  %v4835_v13 = vadd.f32 %v4834_v53, %v4833_v8  ;;  %3261 = vmatmul.mubr.bf16.gmra.mrb[140].mxu1 %v6039_v23 }
 0x1eb   : > { %3414 = vmatmul.mubr.bf16.gmra.mrb[136].mxu0 %v1785_v16  ;;  %5230 = vmatprep.mubr.bf16.mxu1 %v6763_v63  ;;  %v2856_v11 = vadd.f32 %v4729_v20, %v6295_v6 }
 0x1ec   : > { %v6357_v57 = vadd.f32 %v4835_v13, %v2848_v29  ;;  %3421 = vmatprep.mubr.bf16.mxu0 %v6764_v37 }
 0x1ed   : > { %v4730_v22 = vpop.f32.mrb[36].mxu1 }
 0x1ee   : > { %v4731_v36 = vpop.f32.mrb[37].mxu1  ;;  %v4836_v55 = vpop.f32.mrb[32].mxu0 }
 0x1ef   : > { %v4732_v9 = vadd.f32 %v4731_v36, %v4730_v22  ;;  %v4733_v60 = vpop.f32.mrb[38].mxu1  ;;  %v4837_v0 = vpop.f32.mrb[33].mxu0 }
 0x1f0   : > { %v4838_v59 = vadd.f32 %v4837_v0, %v4836_v55  ;;  %v4734_v23 = vpop.f32.mrb[39].mxu1  ;;  %v4839_v1 = vpop.f32.mrb[34].mxu0 }
 0x1f1   : > { %v4735_v3 = vadd.f32 %v4734_v23, %v4733_v60  ;;  %v4840_v19 = vpop.f32.mrb[35].mxu0  ;;  %v2861_v15 = vadd.f32 %v4732_v9, %v6295_v6 }
 0x1f2   : > { %v6365_v12 = vadd.f32 %v4838_v59, %v2853_v31  ;;  %v4841_v50 = vadd.f32 %v4840_v19, %v4839_v1  ;;  %5231 = vmatmul.mubr.bf16.vlgmr.msra.gmra.mrb[144].mxu1 %v5983_v10 }
 0x1f3   : > { %3422 = vmatmul.mubr.bf16.gmra.mrb[140].mxu0 %v1793_v58  ;;  %5234 = vmatprep.mubr.bf16.mxu1 %v6008_v45  ;;  %v2864_v18 = vadd.f32 %v4735_v3, %v6295_v6 }
 0x1f4   : > { %v6371_v42 = vadd.f32 %v4841_v50, %v2856_v11 }
 0x1f5   : > { %v4736_v4 = vpop.f32.mrb[40].mxu1 }
 0x1f6   : > { %v4737_v51 = vpop.f32.mrb[41].mxu1  ;;  %v4842_v48 = vpop.f32.mrb[36].mxu0 }
 0x1f7   : > { %v4738_v56 = vadd.f32 %v4737_v51, %v4736_v4  ;;  %v4739_v24 = vpop.f32.mrb[42].mxu1  ;;  %v4843_v44 = vpop.f32.mrb[37].mxu0 }
 0x1f8   : > { %v4844_v62 = vadd.f32 %v4843_v44, %v4842_v48  ;;  %v4740_v10 = vpop.f32.mrb[43].mxu1  ;;  %v4845_v2 = vpop.f32.mrb[38].mxu0 }
 0x1f9   : > { %v4741_v40 = vadd.f32 %v4740_v10, %v4739_v24  ;;  %v4846_v26 = vpop.f32.mrb[39].mxu0  ;;  %v2869_v37 = vadd.f32 %v4738_v56, %v6295_v6 }
 0x1fa   : > { %v6375_v45 = vadd.f32 %v4844_v62, %v2861_v15  ;;  %v4847_v41 = vadd.f32 %v4846_v26, %v4845_v2  ;;  %5235 = vmatmul.mubr.bf16.gmra.mrb[148].mxu1 %v6043_v46  ;;  %v5430_v46 = vld [vmem:[%s6733_s5 + $0x18] sm:$0xff]  }
 0x1fb   : > { %5238 = vmatprep.mubr.bf16.mxu1 %v6061_v35  ;;  %v2872_v35 = vadd.f32 %v4741_v40, %v6295_v6  ;;  %5268 = vmatprep.subr.bf16.mxu0 %v5430_v46 }
 0x1fc   : > { %v6379_v8 = vadd.f32 %v4847_v41, %v2864_v18  ;;  %5269 = vmatpush3.bf16.msra.mxu0 %v5430_v46 }
 0x1fd   : > { %v4742_v20 = vpop.f32.mrb[44].mxu1 }
 0x1fe   : > { %v4743_v53 = vpop.f32.mrb[45].mxu1  ;;  %v4848_v29 = vpop.f32.mrb[40].mxu0 }
 0x1ff   : > { %v4744_v13 = vadd.f32 %v4743_v53, %v4742_v20  ;;  %v4745_v16 = vpop.f32.mrb[46].mxu1  ;;  %v4849_v63 = vpop.f32.mrb[41].mxu0 }
 0x200   : > { %v4850_v22 = vadd.f32 %v4849_v63, %v4848_v29  ;;  %v4746_v36 = vpop.f32.mrb[47].mxu1  ;;  %v4851_v55 = vpop.f32.mrb[42].mxu0 }
 0x201   : > { %v4747_v9 = vadd.f32 %v4746_v36, %v4745_v16  ;;  %v4852_v60 = vpop.f32.mrb[43].mxu0  ;;  %v2877_v50 = vadd.f32 %v4744_v13, %v6295_v6 }
 0x202   : > { %v6386_v0 = vadd.f32 %v4850_v22, %v2869_v37  ;;  %v4853_v31 = vadd.f32 %v4852_v60, %v4851_v55  ;;  %5239 = vmatmul.mubr.bf16.gmra.mrb[152].mxu1 %v6082_v52 }
 0x203   : > { %5242 = vmatprep.mubr.bf16.mxu1 %v6110_v61  ;;  %v2880_v52 = vadd.f32 %v4747_v9, %v6295_v6 }
 0x204   : > { %v6390_v59 = vadd.f32 %v4853_v31, %v2872_v35 }
 0x205   : > { %v4748_v23 = vpop.f32.mrb[48].mxu1 }
 0x206   : > { %v4749_v1 = vpop.f32.mrb[49].mxu1  ;;  %v4854_v3 = vpop.f32.mrb[44].mxu0 }
 0x207   : > { %v4750_v19 = vadd.f32 %v4749_v1, %v4748_v23  ;;  %v4751_v28 = vpop.f32.mrb[50].mxu1  ;;  %v4855_v11 = vpop.f32.mrb[45].mxu0 }
 0x208   : > { %v4856_v54 = vadd.f32 %v4855_v11, %v4854_v3  ;;  %v4752_v58 = vpop.f32.mrb[51].mxu1  ;;  %v4857_v4 = vpop.f32.mrb[46].mxu0 }
 0x209   : > { %v4753_v51 = vadd.f32 %v4752_v58, %v4751_v28  ;;  %v4858_v48 = vpop.f32.mrb[47].mxu0  ;;  %v2885_v26 = vadd.f32 %v4750_v19, %v6295_v6 }
 0x20a   : > { %v6394_v61 = vadd.f32 %v4856_v54, %v2877_v50  ;;  %v4859_v56 = vadd.f32 %v4858_v48, %v4857_v4  ;;  %5243 = vmatmul.mubr.bf16.gmra.mrb[156].mxu1 %v6130_v25  ;;  %v5431_v25 = vld [vmem:[%s6733_s5 + $0x20] sm:$0xff]  }
 0x20b   : > { %5246 = vmatprep.mubr.bf16.mxu1 %v6150_v5  ;;  %v2888_v5 = vadd.f32 %v4753_v51, %v6295_v6  ;;  %5270 = vmatprep.subr.bf16.mxu0 %v5431_v25 }
 0x20c   : > { %v6398_v24 = vadd.f32 %v4859_v56, %v2880_v52  ;;  %5271 = vmatpush3.bf16.msra.mxu0 %v5431_v25 }
 0x20d   : > { %v4754_v44 = vpop.f32.mrb[52].mxu1 }
 0x20e   : > { %v4755_v15 = vpop.f32.mrb[53].mxu1  ;;  %v4860_v62 = vpop.f32.mrb[48].mxu0 }
 0x20f   : > { %v4756_v10 = vadd.f32 %v4755_v15, %v4754_v44  ;;  %v4757_v2 = vpop.f32.mrb[54].mxu1  ;;  %v4861_v40 = vpop.f32.mrb[49].mxu0 }
 0x210   : > { %v4862_v18 = vadd.f32 %v4861_v40, %v4860_v62  ;;  %v4758_v41 = vpop.f32.mrb[55].mxu1  ;;  %v4863_v20 = vpop.f32.mrb[50].mxu0 }
 0x211   : > { %v4759_v53 = vadd.f32 %v4758_v41, %v4757_v2  ;;  %v4864_v29 = vpop.f32.mrb[51].mxu0  ;;  %v2893_v46 = vadd.f32 %v4756_v10, %v6295_v6 }
 0x212   : > { %v6405_v13 = vadd.f32 %v4862_v18, %v2885_v26  ;;  %v4865_v16 = vadd.f32 %v4864_v29, %v4863_v20  ;;  %5247 = vmatmul.mubr.bf16.gmra.mrb[160].mxu1 %v6166_v39 }
 0x213   : > { %5250 = vmatprep.mubr.bf16.mxu1 %v6183_v7  ;;  %v2896_v39 = vadd.f32 %v4759_v53, %v6295_v6 }
 0x214   : > { %v6409_v63 = vadd.f32 %v4865_v16, %v2888_v5 }
 0x215   : > { %v4760_v37 = vpop.f32.mrb[56].mxu1 }
 0x216   : > { %v4761_v22 = vpop.f32.mrb[57].mxu1  ;;  %v4866_v36 = vpop.f32.mrb[52].mxu0 }
 0x217   : > { %v4762_v55 = vadd.f32 %v4761_v22, %v4760_v37  ;;  %v4763_v9 = vpop.f32.mrb[58].mxu1  ;;  %v4867_v60 = vpop.f32.mrb[53].mxu0 }
 0x218   : > { %v4868_v35 = vadd.f32 %v4867_v60, %v4866_v36  ;;  %v4764_v31 = vpop.f32.mrb[59].mxu1  ;;  %v4869_v23 = vpop.f32.mrb[54].mxu0 }
 0x219   : > { %v4765_v1 = vadd.f32 %v4764_v31, %v4763_v9  ;;  %v4870_v3 = vpop.f32.mrb[55].mxu0  ;;  %v2901_v48 = vadd.f32 %v4762_v55, %v6295_v6 }
 0x21a   : > { %v6413_v7 = vadd.f32 %v4868_v35, %v2893_v46  ;;  %v4871_v19 = vadd.f32 %v4870_v3, %v4869_v23  ;;  %5251 = vmatmul.mubr.bf16.gmra.mrb[164].mxu1 %v6201_v38  ;;  %v5432_v38 = vld [vmem:[%s6733_s5 + $0x28] sm:$0xff]  }
 0x21b   : > { %5254 = vmatprep.mubr.bf16.mxu1 %v6213_v32  ;;  %v2904_v32 = vadd.f32 %v4765_v1, %v6295_v6  ;;  %5272 = vmatprep.subr.bf16.mxu0 %v5432_v38 }
 0x21c   : > { %v6417_v28 = vadd.f32 %v4871_v19, %v2896_v39  ;;  %5273 = vmatpush3.bf16.msra.mxu0 %v5432_v38 }
 0x21d   : > { %v4766_v11 = vpop.f32.mrb[60].mxu1 }
 0x21e   : > { %v4767_v50 = vpop.f32.mrb[61].mxu1  ;;  %v4872_v54 = vpop.f32.mrb[56].mxu0 }
 0x21f   : > { %v4768_v58 = vadd.f32 %v4767_v50, %v4766_v11  ;;  %v4769_v4 = vpop.f32.mrb[62].mxu1  ;;  %v4873_v51 = vpop.f32.mrb[57].mxu0 }
 0x220   : > { %v4874_v52 = vadd.f32 %v4873_v51, %v4872_v54  ;;  %v4770_v56 = vpop.f32.mrb[63].mxu1  ;;  %v4875_v44 = vpop.f32.mrb[58].mxu0 }
 0x221   : > { %v4771_v15 = vadd.f32 %v4770_v56, %v4769_v4  ;;  %v4876_v62 = vpop.f32.mrb[59].mxu0  ;;  %v2909_v25 = vadd.f32 %v4768_v58, %v6295_v6  ;;  %v5433_v58 = vld [vmem:[%s6733_s5 + $0x30] sm:$0xff]  }
 0x222   : > { %v6424_v10 = vadd.f32 %v4874_v52, %v2901_v48  ;;  %v4877_v2 = vadd.f32 %v4876_v62, %v4875_v44  ;;  %5255 = vmatmul.mubr.bf16.gmra.mrb[168].mxu1 %v6325_v34  ;;  %5274 = vmatprep.subr.bf16.mxu0 %v5433_v58 }
 0x223   : > { %5258 = vmatprep.mubr.bf16.mxu1 %v6342_v30  ;;  %v2912_v34 = vadd.f32 %v4771_v15, %v6295_v6  ;;  %5275 = vmatpush3.bf16.msra.mxu0 %v5433_v58 }
 0x224   : > { %v6428_v40 = vadd.f32 %v4877_v2, %v2904_v32 }
 0x225   : > { %v4772_v26 = vpop.f32.mrb[64].mxu1 }
 0x226   : > { %v4773_v18 = vpop.f32.mrb[65].mxu1  ;;  %v4878_v41 = vpop.f32.mrb[60].mxu0 }
 0x227   : > { %v4774_v20 = vadd.f32 %v4773_v18, %v4772_v26  ;;  %v4775_v53 = vpop.f32.mrb[66].mxu1  ;;  %v4879_v29 = vpop.f32.mrb[61].mxu0 }
 0x228   : > { %v4880_v5 = vadd.f32 %v4879_v29, %v4878_v41  ;;  %v4776_v16 = vpop.f32.mrb[67].mxu1  ;;  %v4881_v37 = vpop.f32.mrb[62].mxu0 }
 0x229   : > { %v4777_v22 = vadd.f32 %v4776_v16, %v4775_v53  ;;  %v4882_v36 = vpop.f32.mrb[63].mxu0  ;;  %v2917_v3 = vadd.f32 %v4774_v20, %v6295_v6 }
 0x22a   : > { %v6432_v30 = vadd.f32 %v4880_v5, %v2909_v25  ;;  %v4883_v55 = vadd.f32 %v4882_v36, %v4881_v37  ;;  %5259 = vmatmul.mubr.bf16.gmra.mrb[172].mxu1 %v6762_v17 }
 0x22b   : > { %v2920_v17 = vadd.f32 %v4777_v22, %v6295_v6 }
 0x22c   : > { %v6435_v9 = vadd.f32 %v4883_v55, %v2912_v34 }
 0x22d   : > { %v4778_v60 = vpop.f32.mrb[68].mxu1 }
 0x22e   : > { %v4779_v46 = vpop.f32.mrb[69].mxu1  ;;  %v4884_v35 = vpop.f32.mrb[64].mxu0 }
 0x22f   : > { %v4780_v31 = vadd.f32 %v4779_v46, %v4778_v60  ;;  %v4781_v23 = vpop.f32.mrb[70].mxu1  ;;  %v4885_v1 = vpop.f32.mrb[65].mxu0 }
 0x230   : > { %v4886_v39 = vadd.f32 %v4885_v1, %v4884_v35  ;;  %v4782_v19 = vpop.f32.mrb[71].mxu1  ;;  %v4887_v11 = vpop.f32.mrb[66].mxu0 }
 0x231   : > { %v4783_v50 = vadd.f32 %v4782_v19, %v4781_v23  ;;  %v4888_v54 = vpop.f32.mrb[67].mxu0  ;;  %v2925_v32 = vadd.f32 %v4780_v31, %v6295_v6 }
 0x232   : > { %v6442_v4 = vadd.f32 %v4886_v39, %v2917_v3  ;;  %v4889_v51 = vadd.f32 %v4888_v54, %v4887_v11  ;;  %v5434_v3 = vld [vmem:[%s6733_s5 + $0x38] sm:$0xff]  }
 0x233   : > { %v2928_v53 = vadd.f32 %v4783_v50, %v6295_v6  ;;  %5276 = vmatprep.subr.bf16.mxu0 %v5434_v3 }
 0x234   : > { %v6444_v48 = vadd.f32 %v4889_v51, %v2920_v17  ;;  %5277 = vmatpush3.bf16.msra.mxu0 %v5434_v3 }
 0x235   : > { %v4784_v52 = vpop.f32.mrb[72].mxu1 }
 0x236   : > { %v4785_v56 = vpop.f32.mrb[73].mxu1  ;;  %v4890_v44 = vpop.f32.mrb[68].mxu0 }
 0x237   : > { %v4786_v15 = vadd.f32 %v4785_v56, %v4784_v52  ;;  %v4787_v62 = vpop.f32.mrb[74].mxu1  ;;  %v4891_v38 = vpop.f32.mrb[69].mxu0 }
 0x238   : > { %v4892_v2 = vadd.f32 %v4891_v38, %v4890_v44  ;;  %v4788_v26 = vpop.f32.mrb[75].mxu1  ;;  %v4893_v18 = vpop.f32.mrb[70].mxu0 }
 0x239   : > { %v4789_v41 = vadd.f32 %v4788_v26, %v4787_v62  ;;  %v4894_v20 = vpop.f32.mrb[71].mxu0  ;;  %v2933_v60 = vadd.f32 %v4786_v15, %v6295_v6 }
 0x23a   : > { %v6448_v29 = vadd.f32 %v4892_v2, %v2925_v32  ;;  %v4895_v25 = vadd.f32 %v4894_v20, %v4893_v18 }
 0x23b   : > { %v2936_v39 = vadd.f32 %v4789_v41, %v6295_v6 }
 0x23c   : > { %v6450_v5 = vadd.f32 %v4895_v25, %v2928_v53 }
 0x23d   : > { %v4790_v16 = vpop.f32.mrb[76].mxu1 }
 0x23e   : > { %v4791_v37 = vpop.f32.mrb[77].mxu1  ;;  %v4896_v22 = vpop.f32.mrb[72].mxu0 }
 0x23f   : > { %v4792_v36 = vadd.f32 %v4791_v37, %v4790_v16  ;;  %v4793_v34 = vpop.f32.mrb[78].mxu1  ;;  %v4897_v55 = vpop.f32.mrb[73].mxu0 }
 0x240   : > { %v4898_v46 = vadd.f32 %v4897_v55, %v4896_v22  ;;  %v4794_v35 = vpop.f32.mrb[79].mxu1  ;;  %v4899_v31 = vpop.f32.mrb[74].mxu0 }
 0x241   : > { %v4795_v23 = vadd.f32 %v4794_v35, %v4793_v34  ;;  %v4900_v1 = vpop.f32.mrb[75].mxu0  ;;  %v2941_v44 = vadd.f32 %v4792_v36, %v6295_v6 }
 0x242   : > { %v6457_v19 = vadd.f32 %v4898_v46, %v2933_v60  ;;  %v4901_v11 = vadd.f32 %v4900_v1, %v4899_v31 }
 0x243   : > { %v2944_v18 = vadd.f32 %v4795_v23, %v6295_v6 }
 0x244   : > { %v6459_v50 = vadd.f32 %v4901_v11, %v2936_v39 }
 0x245   : > { %v4924_v54 = vpop.f32.mrb[80].mxu1 }
 0x246   : > { %v4902_v58 = vpop.f32.mrb[76].mxu0  ;;  %v4925_v17 = vpop.f32.mrb[81].mxu1 }
 0x247   : > { %v4926_v51 = vadd.f32 %v4925_v17, %v4924_v54  ;;  %v4903_v52 = vpop.f32.mrb[77].mxu0  ;;  %v4927_v56 = vpop.f32.mrb[82].mxu1 }
 0x248   : > { %v4904_v15 = vadd.f32 %v4903_v52, %v4902_v58  ;;  %v4905_v62 = vpop.f32.mrb[78].mxu0  ;;  %v4928_v38 = vpop.f32.mrb[83].mxu1 }
 0x249   : > { %v3143_v32 = vadd.f32 %v4926_v51, %v6307_v21  ;;  %v4929_v2 = vadd.f32 %v4928_v38, %v4927_v56  ;;  %v4906_v26 = vpop.f32.mrb[79].mxu0 }
 0x24a   : > { %v6464_v41 = vadd.f32 %v4904_v15, %v2941_v44  ;;  %v4907_v20 = vadd.f32 %v4906_v26, %v4905_v62 }
 0x24b   : > { %v3146_v53 = vadd.f32 %v4929_v2, %v6312_v27 }
 0x24c   : > { %v6467_v25 = vadd.f32 %v4907_v20, %v2944_v18 }
 0x24d   : > { %v4930_v16 = vpop.f32.mrb[84].mxu1 }
 0x24e   : > { %v4931_v37 = vpop.f32.mrb[85].mxu1  ;;  %v5036_v22 = vpop.f32.mrb[80].mxu0 }
 0x24f   : > { %v4932_v36 = vadd.f32 %v4931_v37, %v4930_v16  ;;  %v4933_v34 = vpop.f32.mrb[86].mxu1  ;;  %v5037_v55 = vpop.f32.mrb[81].mxu0 }
 0x250   : > { %v5038_v60 = vadd.f32 %v5037_v55, %v5036_v22  ;;  %v4934_v46 = vpop.f32.mrb[87].mxu1  ;;  %v5039_v21 = vpop.f32.mrb[82].mxu0 }
 0x251   : > { %v3151_v35 = vadd.f32 %v4932_v36, %v6320_v43  ;;  %v4935_v31 = vadd.f32 %v4934_v46, %v4933_v34  ;;  %v5040_v6 = vpop.f32.mrb[83].mxu0 }
 0x252   : > { %v5041_v23 = vadd.f32 %v5040_v6, %v5039_v21  ;;  %v6470_v1 = vadd.f32 %v5038_v60, %v3143_v32 }
 0x253   : > { %v3154_v27 = vadd.f32 %v4935_v31, %v6329_v33 }
 0x254   : > { %v6473_v3 = vadd.f32 %v5041_v23, %v3146_v53 }
 0x255   : > { %v4936_v39 = vpop.f32.mrb[88].mxu1 }
 0x256   : > { %v4937_v11 = vpop.f32.mrb[89].mxu1  ;;  %v5042_v54 = vpop.f32.mrb[84].mxu0 }
 0x257   : > { %v4938_v58 = vadd.f32 %v4937_v11, %v4936_v39  ;;  %v4939_v17 = vpop.f32.mrb[90].mxu1  ;;  %v5043_v51 = vpop.f32.mrb[85].mxu0 }
 0x258   : > { %v5044_v52 = vadd.f32 %v5043_v51, %v5042_v54  ;;  %v4940_v56 = vpop.f32.mrb[91].mxu1  ;;  %v5045_v44 = vpop.f32.mrb[86].mxu0 }
 0x259   : > { %v3159_v43 = vadd.f32 %v4938_v58, %v6337_v47  ;;  %v4941_v15 = vadd.f32 %v4940_v56, %v4939_v17  ;;  %v5046_v62 = vpop.f32.mrb[87].mxu0 }
 0x25a   : > { %v5047_v38 = vadd.f32 %v5046_v62, %v5045_v44  ;;  %v6476_v32 = vadd.f32 %v5044_v52, %v3151_v35 }
 0x25b   : > { %v3162_v33 = vadd.f32 %v4941_v15, %v6346_v49 }
 0x25c   : > { %v6479_v2 = vadd.f32 %v5047_v38, %v3154_v27 }
 0x25d   : > { %v4942_v26 = vpop.f32.mrb[92].mxu1 }
 0x25e   : > { %v4943_v18 = vpop.f32.mrb[93].mxu1  ;;  %v5048_v20 = vpop.f32.mrb[88].mxu0 }
 0x25f   : > { %v4944_v53 = vadd.f32 %v4943_v18, %v4942_v26  ;;  %v4945_v16 = vpop.f32.mrb[94].mxu1  ;;  %v5049_v37 = vpop.f32.mrb[89].mxu0 }
 0x260   : > { %v5050_v22 = vadd.f32 %v5049_v37, %v5048_v20  ;;  %v4946_v36 = vpop.f32.mrb[95].mxu1  ;;  %v5051_v34 = vpop.f32.mrb[90].mxu0 }
 0x261   : > { %v3167_v47 = vadd.f32 %v4944_v53, %v6351_v14  ;;  %v4947_v55 = vadd.f32 %v4946_v36, %v4945_v16  ;;  %v5052_v60 = vpop.f32.mrb[91].mxu0 }
 0x262   : > { %v5053_v46 = vadd.f32 %v5052_v60, %v5051_v34  ;;  %v6482_v21 = vadd.f32 %v5050_v22, %v3159_v43 }
 0x263   : > { %v3170_v49 = vadd.f32 %v4947_v55, %v6357_v57 }
 0x264   : > { %v6485_v35 = vadd.f32 %v5053_v46, %v3162_v33 }
 0x265   : > { %v4948_v31 = vpop.f32.mrb[96].mxu1 }
 0x266   : > { %v4949_v6 = vpop.f32.mrb[97].mxu1  ;;  %v5054_v23 = vpop.f32.mrb[92].mxu0 }
 0x267   : > { %v4950_v27 = vadd.f32 %v4949_v6, %v4948_v31  ;;  %v4951_v39 = vpop.f32.mrb[98].mxu1  ;;  %v5055_v11 = vpop.f32.mrb[93].mxu0 }
 0x268   : > { %v5056_v54 = vadd.f32 %v5055_v11, %v5054_v23  ;;  %v4952_v58 = vpop.f32.mrb[99].mxu1  ;;  %v5057_v17 = vpop.f32.mrb[94].mxu0 }
 0x269   : > { %v3175_v14 = vadd.f32 %v4950_v27, %v6365_v12  ;;  %v4953_v51 = vadd.f32 %v4952_v58, %v4951_v39  ;;  %v5058_v52 = vpop.f32.mrb[95].mxu0 }
 0x26a   : > { %v5059_v56 = vadd.f32 %v5058_v52, %v5057_v17  ;;  %v6488_v44 = vadd.f32 %v5056_v54, %v3167_v47 }
 0x26b   : > { %v3178_v57 = vadd.f32 %v4953_v51, %v6371_v42 }
 0x26c   : > { %v6491_v43 = vadd.f32 %v5059_v56, %v3170_v49 }
 0x26d   : > { %v4954_v15 = vpop.f32.mrb[100].mxu1 }
 0x26e   : > { %v4955_v62 = vpop.f32.mrb[101].mxu1  ;;  %v5060_v38 = vpop.f32.mrb[96].mxu0 }
 0x26f   : > { %v4956_v33 = vadd.f32 %v4955_v62, %v4954_v15  ;;  %v4957_v26 = vpop.f32.mrb[102].mxu1  ;;  %v5061_v18 = vpop.f32.mrb[97].mxu0 }
 0x270   : > { %v5062_v20 = vadd.f32 %v5061_v18, %v5060_v38  ;;  %v4958_v53 = vpop.f32.mrb[103].mxu1  ;;  %v5063_v16 = vpop.f32.mrb[98].mxu0 }
 0x271   : > { %v3183_v12 = vadd.f32 %v4956_v33, %v6375_v45  ;;  %v4959_v37 = vadd.f32 %v4958_v53, %v4957_v26  ;;  %v5064_v22 = vpop.f32.mrb[99].mxu0 }
 0x272   : > { %v5065_v36 = vadd.f32 %v5064_v22, %v5063_v16  ;;  %v6494_v34 = vadd.f32 %v5062_v20, %v3175_v14 }
 0x273   : > { %v3186_v42 = vadd.f32 %v4959_v37, %v6379_v8 }
 0x274   : > { %v6497_v47 = vadd.f32 %v5065_v36, %v3178_v57 }
 0x275   : > { %v4960_v55 = vpop.f32.mrb[104].mxu1 }
 0x276   : > { %v4961_v60 = vpop.f32.mrb[105].mxu1  ;;  %v5066_v46 = vpop.f32.mrb[100].mxu0 }
 0x277   : > { %v4962_v49 = vadd.f32 %v4961_v60, %v4960_v55  ;;  %v4963_v31 = vpop.f32.mrb[106].mxu1  ;;  %v5067_v6 = vpop.f32.mrb[101].mxu0 }
 0x278   : > { %v5068_v23 = vadd.f32 %v5067_v6, %v5066_v46  ;;  %v4964_v27 = vpop.f32.mrb[107].mxu1  ;;  %v5069_v39 = vpop.f32.mrb[102].mxu0 }
 0x279   : > { %v3191_v45 = vadd.f32 %v4962_v49, %v6386_v0  ;;  %v4965_v11 = vadd.f32 %v4964_v27, %v4963_v31  ;;  %v5070_v54 = vpop.f32.mrb[103].mxu0 }
 0x27a   : > { %v5071_v58 = vadd.f32 %v5070_v54, %v5069_v39  ;;  %v6500_v17 = vadd.f32 %v5068_v23, %v3183_v12 }
 0x27b   : > { %v3194_v8 = vadd.f32 %v4965_v11, %v6390_v59 }
 0x27c   : > { %v6503_v14 = vadd.f32 %v5071_v58, %v3186_v42 }
 0x27d   : > { %v4966_v51 = vpop.f32.mrb[108].mxu1 }
 0x27e   : > { %v4967_v52 = vpop.f32.mrb[109].mxu1  ;;  %v5072_v56 = vpop.f32.mrb[104].mxu0 }
 0x27f   : > { %v4968_v57 = vadd.f32 %v4967_v52, %v4966_v51  ;;  %v4969_v15 = vpop.f32.mrb[110].mxu1  ;;  %v5073_v62 = vpop.f32.mrb[105].mxu0 }
 0x280   : > { %v5074_v38 = vadd.f32 %v5073_v62, %v5072_v56  ;;  %v4970_v33 = vpop.f32.mrb[111].mxu1  ;;  %v5075_v26 = vpop.f32.mrb[106].mxu0 }
 0x281   : > { %v3199_v0 = vadd.f32 %v4968_v57, %v6394_v61  ;;  %v4971_v18 = vadd.f32 %v4970_v33, %v4969_v15  ;;  %v5076_v20 = vpop.f32.mrb[107].mxu0 }
 0x282   : > { %v5077_v53 = vadd.f32 %v5076_v20, %v5075_v26  ;;  %v6506_v16 = vadd.f32 %v5074_v38, %v3191_v45 }
 0x283   : > { %v3202_v59 = vadd.f32 %v4971_v18, %v6398_v24 }
 0x284   : > { %v6509_v12 = vadd.f32 %v5077_v53, %v3194_v8 }
 0x285   : > { %v4972_v37 = vpop.f32.mrb[112].mxu1 }
 0x286   : > { %v4973_v22 = vpop.f32.mrb[113].mxu1  ;;  %v5078_v36 = vpop.f32.mrb[108].mxu0 }
 0x287   : > { %v4974_v42 = vadd.f32 %v4973_v22, %v4972_v37  ;;  %v4975_v55 = vpop.f32.mrb[114].mxu1  ;;  %v5079_v60 = vpop.f32.mrb[109].mxu0 }
 0x288   : > { %v5080_v46 = vadd.f32 %v5079_v60, %v5078_v36  ;;  %v4976_v49 = vpop.f32.mrb[115].mxu1  ;;  %v5081_v31 = vpop.f32.mrb[110].mxu0 }
 0x289   : > { %v3207_v61 = vadd.f32 %v4974_v42, %v6405_v13  ;;  %v4977_v6 = vadd.f32 %v4976_v49, %v4975_v55  ;;  %v5082_v23 = vpop.f32.mrb[111].mxu0 }
 0x28a   : > { %v5083_v27 = vadd.f32 %v5082_v23, %v5081_v31  ;;  %v6512_v39 = vadd.f32 %v5080_v46, %v3199_v0 }
 0x28b   : > { %v3210_v24 = vadd.f32 %v4977_v6, %v6409_v63 }
 0x28c   : > { %v6515_v45 = vadd.f32 %v5083_v27, %v3202_v59 }
 0x28d   : > { %v4978_v11 = vpop.f32.mrb[116].mxu1 }
 0x28e   : > { %v4979_v54 = vpop.f32.mrb[117].mxu1  ;;  %v5084_v58 = vpop.f32.mrb[112].mxu0 }
 0x28f   : > { %v4980_v8 = vadd.f32 %v4979_v54, %v4978_v11  ;;  %v4981_v51 = vpop.f32.mrb[118].mxu1  ;;  %v5085_v52 = vpop.f32.mrb[113].mxu0 }
 0x290   : > { %v5086_v56 = vadd.f32 %v5085_v52, %v5084_v58  ;;  %v4982_v57 = vpop.f32.mrb[119].mxu1  ;;  %v5087_v15 = vpop.f32.mrb[114].mxu0 }
 0x291   : > { %v3215_v13 = vadd.f32 %v4980_v8, %v6413_v7  ;;  %v4983_v62 = vadd.f32 %v4982_v57, %v4981_v51  ;;  %v5088_v38 = vpop.f32.mrb[115].mxu0 }
 0x292   : > { %v5089_v33 = vadd.f32 %v5088_v38, %v5087_v15  ;;  %v6518_v26 = vadd.f32 %v5086_v56, %v3207_v61 }
 0x293   : > { %v3218_v63 = vadd.f32 %v4983_v62, %v6417_v28 }
 0x294   : > { %v6521_v0 = vadd.f32 %v5089_v33, %v3210_v24 }
 0x295   : > { %v4984_v18 = vpop.f32.mrb[120].mxu1 }
 0x296   : > { %v4985_v20 = vpop.f32.mrb[121].mxu1  ;;  %v5090_v53 = vpop.f32.mrb[116].mxu0 }
 0x297   : > { %v4986_v59 = vadd.f32 %v4985_v20, %v4984_v18  ;;  %v4987_v37 = vpop.f32.mrb[122].mxu1  ;;  %v5091_v22 = vpop.f32.mrb[117].mxu0 }
 0x298   : > { %v5092_v36 = vadd.f32 %v5091_v22, %v5090_v53  ;;  %v4988_v42 = vpop.f32.mrb[123].mxu1  ;;  %v5093_v55 = vpop.f32.mrb[118].mxu0 }
 0x299   : > { %v3223_v7 = vadd.f32 %v4986_v59, %v6424_v10  ;;  %v4989_v60 = vadd.f32 %v4988_v42, %v4987_v37  ;;  %v5094_v46 = vpop.f32.mrb[119].mxu0 }
 0x29a   : > { %v5095_v49 = vadd.f32 %v5094_v46, %v5093_v55  ;;  %v6524_v31 = vadd.f32 %v5092_v36, %v3215_v13 }
 0x29b   : > { %v3226_v28 = vadd.f32 %v4989_v60, %v6428_v40 }
 0x29c   : > { %v6527_v61 = vadd.f32 %v5095_v49, %v3218_v63 }
 0x29d   : > { %v4990_v6 = vpop.f32.mrb[124].mxu1 }
 0x29e   : > { %v4991_v23 = vpop.f32.mrb[125].mxu1  ;;  %v5096_v27 = vpop.f32.mrb[120].mxu0 }
 0x29f   : > { %v4992_v24 = vadd.f32 %v4991_v23, %v4990_v6  ;;  %v4993_v11 = vpop.f32.mrb[126].mxu1  ;;  %v5097_v54 = vpop.f32.mrb[121].mxu0 }
 0x2a0   : > { %v5098_v58 = vadd.f32 %v5097_v54, %v5096_v27  ;;  %v4994_v8 = vpop.f32.mrb[127].mxu1  ;;  %v5099_v51 = vpop.f32.mrb[122].mxu0 }
 0x2a1   : > { %v3231_v10 = vadd.f32 %v4992_v24, %v6432_v30  ;;  %v4995_v52 = vadd.f32 %v4994_v8, %v4993_v11  ;;  %v5100_v56 = vpop.f32.mrb[123].mxu0 }
 0x2a2   : > { %v5101_v57 = vadd.f32 %v5100_v56, %v5099_v51  ;;  %v6530_v15 = vadd.f32 %v5098_v58, %v3223_v7 }
 0x2a3   : > { %v3234_v40 = vadd.f32 %v4995_v52, %v6435_v9 }
 0x2a4   : > { %v6533_v13 = vadd.f32 %v5101_v57, %v3226_v28 }
 0x2a5   : > { %v4996_v62 = vpop.f32.mrb[128].mxu1 }
 0x2a6   : > { %v4997_v38 = vpop.f32.mrb[129].mxu1  ;;  %v5102_v33 = vpop.f32.mrb[124].mxu0 }
 0x2a7   : > { %v4998_v63 = vadd.f32 %v4997_v38, %v4996_v62  ;;  %v4999_v18 = vpop.f32.mrb[130].mxu1  ;;  %v5103_v20 = vpop.f32.mrb[125].mxu0 }
 0x2a8   : > { %v5104_v53 = vadd.f32 %v5103_v20, %v5102_v33  ;;  %v5000_v59 = vpop.f32.mrb[131].mxu1  ;;  %v5105_v37 = vpop.f32.mrb[126].mxu0 }
 0x2a9   : > { %v3239_v30 = vadd.f32 %v4998_v63, %v6442_v4  ;;  %v5001_v22 = vadd.f32 %v5000_v59, %v4999_v18  ;;  %v5106_v36 = vpop.f32.mrb[127].mxu0 }
 0x2aa   : > { %v5107_v42 = vadd.f32 %v5106_v36, %v5105_v37  ;;  %v6536_v55 = vadd.f32 %v5104_v53, %v3231_v10 }
 0x2ab   : > { %v3242_v9 = vadd.f32 %v5001_v22, %v6444_v48 }
 0x2ac   : > { %v6539_v7 = vadd.f32 %v5107_v42, %v3234_v40 }
 0x2ad   : > { %v5002_v60 = vpop.f32.mrb[132].mxu1 }
 0x2ae   : > { %v5003_v46 = vpop.f32.mrb[133].mxu1  ;;  %v5108_v49 = vpop.f32.mrb[128].mxu0 }
 0x2af   : > { %v5004_v28 = vadd.f32 %v5003_v46, %v5002_v60  ;;  %v5005_v6 = vpop.f32.mrb[134].mxu1  ;;  %v5109_v23 = vpop.f32.mrb[129].mxu0 }
 0x2b0   : > { %v5110_v27 = vadd.f32 %v5109_v23, %v5108_v49  ;;  %v5006_v24 = vpop.f32.mrb[135].mxu1  ;;  %v5111_v11 = vpop.f32.mrb[130].mxu0 }
 0x2b1   : > { %v3247_v4 = vadd.f32 %v5004_v28, %v6448_v29  ;;  %v5007_v54 = vadd.f32 %v5006_v24, %v5005_v6  ;;  %v5112_v58 = vpop.f32.mrb[131].mxu0 }
 0x2b2   : > { %v5113_v8 = vadd.f32 %v5112_v58, %v5111_v11  ;;  %v6542_v51 = vadd.f32 %v5110_v27, %v3239_v30 }
 0x2b3   : > { %v3250_v48 = vadd.f32 %v5007_v54, %v6450_v5 }
 0x2b4   : > { %v6545_v10 = vadd.f32 %v5113_v8, %v3242_v9 }
 0x2b5   : > { %v5008_v52 = vpop.f32.mrb[136].mxu1 }
 0x2b6   : > { %v5009_v56 = vpop.f32.mrb[137].mxu1  ;;  %v5114_v57 = vpop.f32.mrb[132].mxu0 }
 0x2b7   : > { %v5010_v40 = vadd.f32 %v5009_v56, %v5008_v52  ;;  %v5011_v62 = vpop.f32.mrb[138].mxu1  ;;  %v5115_v38 = vpop.f32.mrb[133].mxu0 }
 0x2b8   : > { %v5116_v33 = vadd.f32 %v5115_v38, %v5114_v57  ;;  %v5012_v63 = vpop.f32.mrb[139].mxu1  ;;  %v5117_v18 = vpop.f32.mrb[134].mxu0 }
 0x2b9   : > { %v3255_v29 = vadd.f32 %v5010_v40, %v6457_v19  ;;  %v5013_v20 = vadd.f32 %v5012_v63, %v5011_v62  ;;  %v5118_v53 = vpop.f32.mrb[135].mxu0 }
 0x2ba   : > { %v5119_v59 = vadd.f32 %v5118_v53, %v5117_v18  ;;  %v6548_v37 = vadd.f32 %v5116_v33, %v3247_v4 }
 0x2bb   : > { %v3258_v5 = vadd.f32 %v5013_v20, %v6459_v50 }
 0x2bc   : > { %v6551_v30 = vadd.f32 %v5119_v59, %v3250_v48 }
 0x2bd   : > { %v5014_v22 = vpop.f32.mrb[140].mxu1 }
 0x2be   : > { %v5015_v36 = vpop.f32.mrb[141].mxu1  ;;  %v5120_v42 = vpop.f32.mrb[136].mxu0 }
 0x2bf   : > { %v5016_v9 = vadd.f32 %v5015_v36, %v5014_v22  ;;  %v5017_v60 = vpop.f32.mrb[142].mxu1  ;;  %v5121_v46 = vpop.f32.mrb[137].mxu0 }
 0x2c0   : > { %v5122_v49 = vadd.f32 %v5121_v46, %v5120_v42  ;;  %v5018_v28 = vpop.f32.mrb[143].mxu1  ;;  %v5123_v6 = vpop.f32.mrb[138].mxu0 }
 0x2c1   : > { %v3263_v19 = vadd.f32 %v5016_v9, %v6464_v41  ;;  %v5019_v23 = vadd.f32 %v5018_v28, %v5017_v60  ;;  %v5124_v27 = vpop.f32.mrb[139].mxu0 }
 0x2c2   : > { %v5125_v24 = vadd.f32 %v5124_v27, %v5123_v6  ;;  %v6554_v11 = vadd.f32 %v5122_v49, %v3255_v29 }
 0x2c3   : > { %v3266_v50 = vadd.f32 %v5019_v23, %v6467_v25 }
 0x2c4   : > { %v6557_v4 = vadd.f32 %v5125_v24, %v3258_v5 }
 0x2c5   : > { %v5232_v54 = vpop.f32.mrb[144].mxu1 }
 0x2c6   : > { %v3473_v58 = vadd.f32 %v5232_v54, %v6476_v32  ;;  %v5126_v8 = vpop.f32.mrb[140].mxu0  ;;  %v3464_v48 = vpop.f32.mrb[145].mxu1 }
 0x2c7   : > { %v3465_v52 = vadd.f32 %v3464_v48, %v6470_v1  ;;  %v5127_v56 = vpop.f32.mrb[141].mxu0  ;;  %v5233_v57 = vpop.f32.mrb[146].mxu1 }
 0x2c8   : > { %v5128_v40 = vadd.f32 %v5127_v56, %v5126_v8  ;;  %v3476_v41 = vadd.f32 %v5233_v57, %v6479_v2  ;;  %v5129_v62 = vpop.f32.mrb[142].mxu0  ;;  %v3467_v38 = vpop.f32.mrb[147].mxu1  ;;  %v3593_v25 = vmax.f32 %v3473_v58, 0.0 }
 0x2c9   : > { %v3468_v33 = vadd.f32 %v3467_v38, %v6473_v3  ;;  %v5130_v63 = vpop.f32.mrb[143].mxu0  ;;  %v3591_v32 = vmax.f32 %v3465_v52, 0.0 }
 0x2ca   : > { %v3594_v18 = vmax.f32 %v3476_v41, 0.0  ;;  %v5131_v29 = vadd.f32 %v5130_v63, %v5129_v62  ;;  %v6563_v20 = vadd.f32 %v5128_v40, %v3263_v19 }
 0x2cb   : > { %v3592_v53 = vmax.f32 %v3468_v33, 0.0 }
 0x2cc   : > { %v3624_v59 = vpack.c.bf16 %v3594_v18, %v3593_v25  ;;  %v6565_v5 = vadd.f32 %v5131_v29, %v3266_v50 }
 0x2cd   : > { %v3623_v1 = vpack.c.bf16 %v3592_v53, %v3591_v32  ;;  %v5236_v22 = vpop.f32.mrb[148].mxu1 }
 0x2ce   : > { %v3489_v36 = vadd.f32 %v5236_v22, %v6488_v44  ;;  %v3480_v2 = vpop.f32.mrb[149].mxu1 }
 0x2cf   : > { %v3481_v42 = vadd.f32 %v3480_v2, %v6482_v21  ;;  %v5237_v9 = vpop.f32.mrb[150].mxu1  ;;  %5278 = vmatprep.mubr.bf16.mxu0 %v3623_v1 }
 0x2d0   : > { %v3492_v3 = vadd.f32 %v5237_v9, %v6491_v43  ;;  %v3483_v60 = vpop.f32.mrb[151].mxu1  ;;  %5279 = vmatmul.mubr.bf16.vlgmr.msra.gmra.mrb[144].mxu0 %v3624_v59  ;;  %v3597_v49 = vmax.f32 %v3489_v36, 0.0 }
 0x2d1   : > { %v3484_v46 = vadd.f32 %v3483_v60, %v6485_v35  ;;  %v3595_v6 = vmax.f32 %v3481_v42, 0.0 }
 0x2d2   : > { %v3598_v28 = vmax.f32 %v3492_v3, 0.0 }
 0x2d3   : > { %v3596_v19 = vmax.f32 %v3484_v46, 0.0 }
 0x2d4   : > { %v3626_v23 = vpack.c.bf16 %v3598_v28, %v3597_v49 }
 0x2d5   : > { %v3625_v27 = vpack.c.bf16 %v3596_v19, %v3595_v6  ;;  %v5240_v24 = vpop.f32.mrb[152].mxu1 }
 0x2d6   : > { %v3505_v44 = vadd.f32 %v5240_v24, %v6500_v17  ;;  %v3496_v50 = vpop.f32.mrb[153].mxu1 }
 0x2d7   : > { %v3497_v21 = vadd.f32 %v3496_v50, %v6494_v34  ;;  %v5241_v54 = vpop.f32.mrb[154].mxu1  ;;  %5282 = vmatprep.mubr.bf16.mxu0 %v3625_v27 }
 0x2d8   : > { %v3508_v43 = vadd.f32 %v5241_v54, %v6503_v14  ;;  %v3499_v58 = vpop.f32.mrb[155].mxu1  ;;  %5283 = vmatmul.mubr.bf16.gmra.mrb[148].mxu0 %v3626_v23  ;;  %v3601_v8 = vmax.f32 %v3505_v44, 0.0 }
 0x2d9   : > { %v3500_v35 = vadd.f32 %v3499_v58, %v6497_v47  ;;  %v3599_v52 = vmax.f32 %v3497_v21, 0.0 }
 0x2da   : > { %v3602_v48 = vmax.f32 %v3508_v43, 0.0 }
 0x2db   : > { %v3600_v56 = vmax.f32 %v3500_v35, 0.0 }
 0x2dc   : > { %v3628_v57 = vpack.c.bf16 %v3602_v48, %v3601_v8 }
 0x2dd   : > { %v3627_v40 = vpack.c.bf16 %v3600_v56, %v3599_v52  ;;  %v5244_v41 = vpop.f32.mrb[156].mxu1 }
 0x2de   : > { %v3521_v17 = vadd.f32 %v5244_v41, %v6512_v39  ;;  %v3512_v62 = vpop.f32.mrb[157].mxu1 }
 0x2df   : > { %v3513_v34 = vadd.f32 %v3512_v62, %v6506_v16  ;;  %v5245_v38 = vpop.f32.mrb[158].mxu1  ;;  %5286 = vmatprep.mubr.bf16.mxu0 %v3627_v40 }
 0x2e0   : > { %v3524_v14 = vadd.f32 %v5245_v38, %v6515_v45  ;;  %v3515_v33 = vpop.f32.mrb[159].mxu1  ;;  %5287 = vmatmul.mubr.bf16.gmra.mrb[152].mxu0 %v3628_v57  ;;  %v3605_v63 = vmax.f32 %v3521_v17, 0.0 }
 0x2e1   : > { %v3516_v47 = vadd.f32 %v3515_v33, %v6509_v12  ;;  %v3603_v18 = vmax.f32 %v3513_v34, 0.0 }
 0x2e2   : > { %v3606_v25 = vmax.f32 %v3524_v14, 0.0 }
 0x2e3   : > { %v3604_v29 = vmax.f32 %v3516_v47, 0.0 }
 0x2e4   : > { %v3630_v32 = vpack.c.bf16 %v3606_v25, %v3605_v63 }
 0x2e5   : > { %v3629_v53 = vpack.c.bf16 %v3604_v29, %v3603_v18  ;;  %v5248_v59 = vpop.f32.mrb[160].mxu1  ;;  %v4589_v18 = vld [vmem:[%s5533_s12] sm:$0xff]  }
 0x2e6   : > { %v3537_v39 = vadd.f32 %v5248_v59, %v6524_v31  ;;  %v3528_v1 = vpop.f32.mrb[161].mxu1 }
 0x2e7   : > { %v3529_v16 = vadd.f32 %v3528_v1, %v6518_v26  ;;  %v5249_v22 = vpop.f32.mrb[162].mxu1  ;;  %5290 = vmatprep.mubr.bf16.mxu0 %v3629_v53 }
 0x2e8   : > { %v3540_v45 = vadd.f32 %v5249_v22, %v6527_v61  ;;  %v3531_v36 = vpop.f32.mrb[163].mxu1  ;;  %5291 = vmatmul.mubr.bf16.gmra.mrb[156].mxu0 %v3630_v32  ;;  %v3609_v2 = vmax.f32 %v3537_v39, 0.0 }
 0x2e9   : > { %v3532_v12 = vadd.f32 %v3531_v36, %v6521_v0  ;;  %v3607_v9 = vmax.f32 %v3529_v16, 0.0  ;;  %v4591_v16 = vunpack.c.h.bf16 %v4589_v18 }
 0x2ea   : > { %v3610_v42 = vmax.f32 %v3540_v45, 0.0 }
 0x2eb   : > { %v3608_v3 = vmax.f32 %v3532_v12, 0.0 }
 0x2ec   : > { %v3632_v60 = vpack.c.bf16 %v3610_v42, %v3609_v2  ;;  %v4654_v42 = vld [vmem:[%s5533_s12 + $0x18] sm:$0xff]  }
 0x2ed   : > { %v3631_v46 = vpack.c.bf16 %v3608_v3, %v3607_v9  ;;  %v5252_v49 = vpop.f32.mrb[164].mxu1 }
 0x2ee   : > { %v3553_v31 = vadd.f32 %v5252_v49, %v6536_v55  ;;  %v3544_v28 = vpop.f32.mrb[165].mxu1 }
 0x2ef   : > { %v3545_v26 = vadd.f32 %v3544_v28, %v6530_v15  ;;  %v5253_v6 = vpop.f32.mrb[166].mxu1  ;;  %5294 = vmatprep.mubr.bf16.mxu0 %v3631_v46 }
 0x2f0   : > { %v3556_v61 = vadd.f32 %v5253_v6, %v6539_v7  ;;  %v3547_v19 = vpop.f32.mrb[167].mxu1  ;;  %5295 = vmatmul.mubr.bf16.gmra.mrb[160].mxu0 %v3632_v60  ;;  %v3613_v23 = vmax.f32 %v3553_v31, 0.0  ;;  %v4653_v60 = vld [vmem:[%s5533_s12 + $0x10] sm:$0xff]  }
 0x2f1   : > { %v3548_v0 = vadd.f32 %v3547_v19, %v6533_v13  ;;  %v3611_v24 = vmax.f32 %v3545_v26, 0.0  ;;  %v4602_v26 = vunpack.c.l.bf16 %v4654_v42 }
 0x2f2   : > { %v3614_v27 = vmax.f32 %v3556_v61, 0.0 }
 0x2f3   : > { %v3612_v44 = vmax.f32 %v3548_v0, 0.0  ;;  %v4598_v0 = vunpack.c.l.bf16 %v4653_v60 }
 0x2f4   : > { %v3634_v50 = vpack.c.bf16 %v3614_v27, %v3613_v23 }
 0x2f5   : > { %v3633_v21 = vpack.c.bf16 %v3612_v44, %v3611_v24  ;;  %v5256_v54 = vpop.f32.mrb[168].mxu1  ;;  %v4603_v44 = vunpack.c.h.bf16 %v4654_v42 }
 0x2f6   : > { %v3569_v55 = vadd.f32 %v5256_v54, %v6548_v37  ;;  %v3560_v43 = vpop.f32.mrb[169].mxu1 }
 0x2f7   : > { %v3561_v15 = vadd.f32 %v3560_v43, %v6542_v51  ;;  %v5257_v58 = vpop.f32.mrb[170].mxu1  ;;  %5298 = vmatprep.mubr.bf16.mxu0 %v3633_v21 }
 0x2f8   : > { %v3572_v7 = vadd.f32 %v5257_v58, %v6551_v30  ;;  %v3563_v35 = vpop.f32.mrb[171].mxu1  ;;  %5299 = vmatmul.mubr.bf16.gmra.mrb[164].mxu0 %v3634_v50  ;;  %v3617_v8 = vmax.f32 %v3569_v55, 0.0  ;;  %v4599_v55 = vunpack.c.h.bf16 %v4653_v60 }
 0x2f9   : > { %v3564_v13 = vadd.f32 %v3563_v35, %v6545_v10  ;;  %v3615_v52 = vmax.f32 %v3561_v15, 0.0 }
 0x2fa   : > { %v3618_v48 = vmax.f32 %v3572_v7, 0.0 }
 0x2fb   : > { %v3616_v56 = vmax.f32 %v3564_v13, 0.0  ;;  %v4656_v13 = vld [vmem:[%s5533_s12 + $0x28] sm:$0xff]  }
 0x2fc   : > { %v3636_v57 = vpack.c.bf16 %v3618_v48, %v3617_v8 }
 0x2fd   : > { %v3635_v40 = vpack.c.bf16 %v3616_v56, %v3615_v52  ;;  %v5260_v41 = vpop.f32.mrb[172].mxu1  ;;  %v4655_v52 = vld [vmem:[%s5533_s12 + $0x20] sm:$0xff]  }
 0x2fe   : > { %v3585_v37 = vadd.f32 %v5260_v41, %v6563_v20  ;;  %v3576_v17 = vpop.f32.mrb[173].mxu1  ;;  %v4652_v20 = vld [vmem:[%s5533_s12 + $0x8] sm:$0xff]  }
 0x2ff   : > { %v3577_v51 = vadd.f32 %v3576_v17, %v6554_v11  ;;  %v5261_v62 = vpop.f32.mrb[174].mxu1  ;;  %5302 = vmatprep.mubr.bf16.mxu0 %v3635_v40  ;;  %v6600_v11 = vld [vmem:[%s6734_s6] ss:$0 sm:$0xff]  ;;  %v4595_v59 = vunpack.c.h.bf16 %v4652_v20 }
 0x300   : > { %v3588_v30 = vadd.f32 %v5261_v62, %v6565_v5  ;;  %v3579_v34 = vpop.f32.mrb[175].mxu1  ;;  %5303 = vmatmul.mubr.bf16.gmra.mrb[168].mxu0 %v3636_v57  ;;  %v3621_v38 = vmax.f32 %v3585_v37, 0.0  ;;  %v4594_v5 = vunpack.c.l.bf16 %v4652_v20  ;;  %v4610_v37 = vunpack.c.l.bf16 %v4656_v13 }
 0x301   : > { %v3580_v10 = vadd.f32 %v3579_v34, %v6557_v4  ;;  %v3619_v33 = vmax.f32 %v3577_v51, 0.0  ;;  %v4590_v4 = vunpack.c.l.bf16 %v4589_v18 }
 0x302   : > { %v3622_v14 = vmax.f32 %v3588_v30, 0.0  ;;  %v4606_v30 = vunpack.c.l.bf16 %v4655_v52 }
 0x303   : > { %v3620_v47 = vmax.f32 %v3580_v10, 0.0 }
 0x304   : > { %v3638_v63 = vpack.c.bf16 %v3622_v14, %v3621_v38  ;;  %v4611_v14 = vunpack.c.h.bf16 %v4656_v13 }
 0x305   : > { %v3637_v25 = vpack.c.bf16 %v3620_v47, %v3619_v33 }
 0x307   : > { %5306 = vmatprep.mubr.bf16.mxu0 %v3637_v25  ;;  %v4607_v25 = vunpack.c.h.bf16 %v4655_v52 }
 0x308   : > { %5307 = vmatmul.mubr.bf16.gmra.mrb[172].mxu0 %v3638_v63 }
 0x3a3   : > { %v5280_v29 = vpop.f32.mrb[144].mxu0 }
 0x3a4   : > { %v3788_v32 = vadd.f32 %v5280_v29, %v6600_v11  ;;  %v3779_v53 = vpop.f32.mrb[145].mxu0 }
 0x3a5   : > { %v3780_v39 = vadd.f32 %v6600_v11, %v3779_v53  ;;  %v5281_v1 = vpop.f32.mrb[146].mxu0 }
 0x3a6   : > { %v3940_v22 = vadd.f32 %v4594_v5, %v3788_v32  ;;  %v3791_v45 = vadd.f32 %v5281_v1, %v6600_v11  ;;  %v3782_v36 = vpop.f32.mrb[147].mxu0  ;;  %v4658_v32 = vld [vmem:[%s5533_s12 + $0x38] sm:$0xff]  }
 0x3a7   : > { %v3938_v12 = vadd.f32 %v4590_v4, %v3780_v39  ;;  %v3783_v2 = vadd.f32 %v6600_v11, %v3782_v36  ;;  %v4657_v39 = vld [vmem:[%s5533_s12 + $0x30] sm:$0xff]   ;;  %v4618_v36 = vunpack.c.l.bf16 %v4658_v32 }
 0x3a8   : > { %v3972_v9 = vmax.f32 %v3940_v22, 0.0  ;;  %v3941_v3 = vadd.f32 %v4595_v59, %v3791_v45 }
 0x3a9   : > { %v3970_v46 = vmax.f32 %v3938_v12, 0.0  ;;  %v3939_v49 = vadd.f32 %v4591_v16, %v3783_v2 }
 0x3aa   : > { %v4558_v31 = vpack.c.bf16 %v3972_v9, %v3972_v9  ;;  %v3973_v28 = vmax.f32 %v3941_v3, 0.0  ;;  %v4614_v9 = vunpack.c.l.bf16 %v4657_v39 }
 0x3ab   : > { %v4556_v6 = vpack.c.bf16 %v3970_v46, %v3970_v46  ;;  %v3971_v61 = vmax.f32 %v3939_v49, 0.0  ;;  %v5284_v19 = vpop.f32.mrb[148].mxu0  ;;  %v4619_v49 = vunpack.c.h.bf16 %v4658_v32 }
 0x3ac   : > { %4133 = vst.msk [vmem:[%s6613_s30 + $0x8] sm:$0xf] %vm4130_vm15, %v4558_v31  ;;  %v4559_v23 = vpack.c.bf16 %v3973_v28, %v3973_v28  ;;  %v3804_v27 = vadd.f32 %v5284_v19, %v6600_v11  ;;  %v3795_v24 = vpop.f32.mrb[149].mxu0 }
 0x3ad   : > { %4131 = vst.msk [vmem:[%s6613_s30] sm:$0xf] %vm4130_vm15, %v4556_v6  ;;  %v4557_v50 = vpack.c.bf16 %v3971_v61, %v3971_v61  ;;  %v3796_v21 = vadd.f32 %v6600_v11, %v3795_v24  ;;  %v5285_v54 = vpop.f32.mrb[150].mxu0  ;;  %v4615_v6 = vunpack.c.h.bf16 %v4657_v39  ;;  %v4660_v24 = vld [vmem:[%s5533_s12 + $0x48] sm:$0xff]  }
 0x3ae   : > { %4134 = vst.msk [vmem:[%s6613_s30 + $0xc] sm:$0xf] %vm4130_vm15, %v4559_v23  ;;  %v3944_v43 = vadd.f32 %v4602_v26, %v3804_v27  ;;  %v3807_v15 = vadd.f32 %v5285_v54, %v6600_v11  ;;  %v3798_v58 = vpop.f32.mrb[151].mxu0 }
 0x3af   : > { %4132 = vst.msk [vmem:[%s6613_s30 + $0x4] sm:$0xf] %vm4130_vm15, %v4557_v50  ;;  %v3942_v7 = vadd.f32 %v4598_v0, %v3796_v21  ;;  %v3799_v35 = vadd.f32 %v6600_v11, %v3798_v58  ;;  %v4659_v21 = vld [vmem:[%s5533_s12 + $0x40] sm:$0xff]   ;;  %v4626_v58 = vunpack.c.l.bf16 %v4660_v24 }
 0x3b0   : > { %v3976_v8 = vmax.f32 %v3944_v43, 0.0  ;;  %v3945_v48 = vadd.f32 %v4603_v44, %v3807_v15 }
 0x3b1   : > { %v3974_v56 = vmax.f32 %v3942_v7, 0.0  ;;  %v3943_v57 = vadd.f32 %v4599_v55, %v3799_v35 }
 0x3b2   : > { %v4562_v40 = vpack.c.bf16 %v3976_v8, %v3976_v8  ;;  %v3977_v41 = vmax.f32 %v3945_v48, 0.0  ;;  %v4622_v8 = vunpack.c.l.bf16 %v4659_v21 }
 0x3b3   : > { %v4560_v17 = vpack.c.bf16 %v3974_v56, %v3974_v56  ;;  %v3975_v51 = vmax.f32 %v3943_v57, 0.0  ;;  %v5288_v62 = vpop.f32.mrb[152].mxu0  ;;  %v4627_v57 = vunpack.c.h.bf16 %v4660_v24 }
 0x3b4   : > { %4137 = vst.msk [vmem:[%s6613_s30 + $0x18] sm:$0xf] %vm4130_vm15, %v4562_v40  ;;  %v4563_v34 = vpack.c.bf16 %v3977_v41, %v3977_v41  ;;  %v3820_v10 = vadd.f32 %v5288_v62, %v6600_v11  ;;  %v3811_v38 = vpop.f32.mrb[153].mxu0 }
 0x3b5   : > { %4135 = vst.msk [vmem:[%s6613_s30 + $0x10] sm:$0xf] %vm4130_vm15, %v4560_v17  ;;  %v4561_v33 = vpack.c.bf16 %v3975_v51, %v3975_v51  ;;  %v3812_v47 = vadd.f32 %v6600_v11, %v3811_v38  ;;  %v5289_v63 = vpop.f32.mrb[154].mxu0  ;;  %v4623_v17 = vunpack.c.h.bf16 %v4659_v21  ;;  %v4662_v38 = vld [vmem:[%s5533_s12 + $0x58] sm:$0xff]  }
 0x3b6   : > { %4138 = vst.msk [vmem:[%s6613_s30 + $0x1c] sm:$0xf] %vm4130_vm15, %v4563_v34  ;;  %v3948_v20 = vadd.f32 %v4610_v37, %v3820_v10  ;;  %v3823_v18 = vadd.f32 %v5289_v63, %v6600_v11  ;;  %v3814_v5 = vpop.f32.mrb[155].mxu0 }
 0x3b7   : > { %4136 = vst.msk [vmem:[%s6613_s30 + $0x14] sm:$0xf] %vm4130_vm15, %v4561_v33  ;;  %v3946_v29 = vadd.f32 %v4606_v30, %v3812_v47  ;;  %v3815_v4 = vadd.f32 %v6600_v11, %v3814_v5  ;;  %v4661_v47 = vld [vmem:[%s5533_s12 + $0x50] sm:$0xff]   ;;  %v4634_v5 = vunpack.c.l.bf16 %v4662_v38 }
 0x3b8   : > { %v3980_v53 = vmax.f32 %v3948_v20, 0.0  ;;  %v3949_v59 = vadd.f32 %v4611_v14, %v3823_v18 }
 0x3b9   : > { %v3978_v1 = vmax.f32 %v3946_v29, 0.0  ;;  %v3947_v16 = vadd.f32 %v4607_v25, %v3815_v4 }
 0x3ba   : > { %v4566_v22 = vpack.c.bf16 %v3980_v53, %v3980_v53  ;;  %v3981_v45 = vmax.f32 %v3949_v59, 0.0  ;;  %v4630_v53 = vunpack.c.l.bf16 %v4661_v47 }
 0x3bb   : > { %v4564_v12 = vpack.c.bf16 %v3978_v1, %v3978_v1  ;;  %v3979_v2 = vmax.f32 %v3947_v16, 0.0  ;;  %v5292_v42 = vpop.f32.mrb[156].mxu0  ;;  %v4635_v16 = vunpack.c.h.bf16 %v4662_v38 }
 0x3bc   : > { %4141 = vst.msk [vmem:[%s6613_s30 + $0x28] sm:$0xf] %vm4130_vm15, %v4566_v22  ;;  %v4567_v3 = vpack.c.bf16 %v3981_v45, %v3981_v45  ;;  %v3836_v60 = vadd.f32 %v5292_v42, %v6600_v11  ;;  %v3827_v46 = vpop.f32.mrb[157].mxu0 }
 0x3bd   : > { %4139 = vst.msk [vmem:[%s6613_s30 + $0x20] sm:$0xf] %vm4130_vm15, %v4564_v12  ;;  %v4565_v31 = vpack.c.bf16 %v3979_v2, %v3979_v2  ;;  %v3828_v28 = vadd.f32 %v6600_v11, %v3827_v46  ;;  %v5293_v26 = vpop.f32.mrb[158].mxu0  ;;  %v4631_v12 = vunpack.c.h.bf16 %v4661_v47  ;;  %v4664_v46 = vld [vmem:[%s5533_s12 + $0x68] sm:$0xff]  }
 0x3be   : > { %4142 = vst.msk [vmem:[%s6613_s30 + $0x2c] sm:$0xf] %vm4130_vm15, %v4567_v3  ;;  %v3952_v61 = vadd.f32 %v4618_v36, %v3836_v60  ;;  %v3839_v19 = vadd.f32 %v5293_v26, %v6600_v11  ;;  %v3830_v0 = vpop.f32.mrb[159].mxu0 }
 0x3bf   : > { %4140 = vst.msk [vmem:[%s6613_s30 + $0x24] sm:$0xf] %vm4130_vm15, %v4565_v31  ;;  %v3950_v23 = vadd.f32 %v4614_v9, %v3828_v28  ;;  %v3831_v27 = vadd.f32 %v6600_v11, %v3830_v0  ;;  %v4663_v28 = vld [vmem:[%s5533_s12 + $0x60] sm:$0xff]   ;;  %v4642_v0 = vunpack.c.l.bf16 %v4664_v46 }
 0x3c0   : > { %v3984_v44 = vmax.f32 %v3952_v61, 0.0  ;;  %v3953_v50 = vadd.f32 %v4619_v49, %v3839_v19 }
 0x3c1   : > { %v3982_v54 = vmax.f32 %v3950_v23, 0.0  ;;  %v3951_v55 = vadd.f32 %v4615_v6, %v3831_v27 }
 0x3c2   : > { %v4570_v43 = vpack.c.bf16 %v3984_v44, %v3984_v44  ;;  %v3985_v15 = vmax.f32 %v3953_v50, 0.0  ;;  %v4638_v44 = vunpack.c.l.bf16 %v4663_v28 }
 0x3c3   : > { %v4568_v7 = vpack.c.bf16 %v3982_v54, %v3982_v54  ;;  %v3983_v35 = vmax.f32 %v3951_v55, 0.0  ;;  %v5296_v13 = vpop.f32.mrb[160].mxu0  ;;  %v4643_v55 = vunpack.c.h.bf16 %v4664_v46 }
 0x3c4   : > { %4145 = vst.msk [vmem:[%s6613_s30 + $0x38] sm:$0xf] %vm4130_vm15, %v4570_v43  ;;  %v4571_v48 = vpack.c.bf16 %v3985_v15, %v3985_v15  ;;  %v3852_v52 = vadd.f32 %v5296_v13, %v6600_v11  ;;  %v3843_v56 = vpop.f32.mrb[161].mxu0 }
 0x3c5   : > { %4143 = vst.msk [vmem:[%s6613_s30 + $0x30] sm:$0xf] %vm4130_vm15, %v4568_v7  ;;  %v4569_v40 = vpack.c.bf16 %v3983_v35, %v3983_v35  ;;  %v3844_v41 = vadd.f32 %v6600_v11, %v3843_v56  ;;  %v5297_v37 = vpop.f32.mrb[162].mxu0  ;;  %v4639_v7 = vunpack.c.h.bf16 %v4663_v28  ;;  %v4666_v56 = vld [vmem:[%s5533_s12 + $0x78] sm:$0xff]  }
 0x3c6   : > { %4146 = vst.msk [vmem:[%s6613_s30 + $0x3c] sm:$0xf] %vm4130_vm15, %v4571_v48  ;;  %v3956_v51 = vadd.f32 %v4626_v58, %v3852_v52  ;;  %v3855_v62 = vadd.f32 %v5297_v37, %v6600_v11  ;;  %v3846_v30 = vpop.f32.mrb[163].mxu0 }
 0x3c7   : > { %4144 = vst.msk [vmem:[%s6613_s30 + $0x34] sm:$0xf] %vm4130_vm15, %v4569_v40  ;;  %v3954_v34 = vadd.f32 %v4622_v8, %v3844_v41  ;;  %v3847_v10 = vadd.f32 %v6600_v11, %v3846_v30  ;;  %v4665_v41 = vld [vmem:[%s5533_s12 + $0x70] sm:$0xff]   ;;  %v4650_v30 = vunpack.c.l.bf16 %v4666_v56 }
 0x3c8   : > { %v3988_v14 = vmax.f32 %v3956_v51, 0.0  ;;  %v3957_v33 = vadd.f32 %v4627_v57, %v3855_v62 }
 0x3c9   : > { %v3986_v63 = vmax.f32 %v3954_v34, 0.0  ;;  %v3955_v25 = vadd.f32 %v4623_v17, %v3847_v10 }
 0x3ca   : > { %v4574_v20 = vpack.c.bf16 %v3988_v14, %v3988_v14  ;;  %v3989_v18 = vmax.f32 %v3957_v33, 0.0  ;;  %v4646_v14 = vunpack.c.l.bf16 %v4665_v41 }
 0x3cb   : > { %v4572_v29 = vpack.c.bf16 %v3986_v63, %v3986_v63  ;;  %v3987_v4 = vmax.f32 %v3955_v25, 0.0  ;;  %v5300_v32 = vpop.f32.mrb[164].mxu0  ;;  %v4651_v25 = vunpack.c.h.bf16 %v4666_v56 }
 0x3cc   : > { %4149 = vst.msk [vmem:[%s6613_s30 + $0x48] sm:$0xf] %vm4130_vm15, %v4574_v20  ;;  %v4575_v59 = vpack.c.bf16 %v3989_v18, %v3989_v18  ;;  %v3868_v39 = vadd.f32 %v5300_v32, %v6600_v11  ;;  %v3859_v1 = vpop.f32.mrb[165].mxu0 }
 0x3cd   : > { %4147 = vst.msk [vmem:[%s6613_s30 + $0x40] sm:$0xf] %vm4130_vm15, %v4572_v29  ;;  %v4573_v22 = vpack.c.bf16 %v3987_v4, %v3987_v4  ;;  %v3860_v45 = vadd.f32 %v6600_v11, %v3859_v1  ;;  %v5301_v36 = vpop.f32.mrb[166].mxu0  ;;  %v4647_v29 = vunpack.c.h.bf16 %v4665_v41 }
 0x3ce   : > { %4150 = vst.msk [vmem:[%s6613_s30 + $0x4c] sm:$0xf] %vm4130_vm15, %v4575_v59  ;;  %v3960_v2 = vadd.f32 %v4634_v5, %v3868_v39  ;;  %v3871_v42 = vadd.f32 %v5301_v36, %v6600_v11  ;;  %v3862_v9 = vpop.f32.mrb[167].mxu0 }
 0x3cf   : > { %4148 = vst.msk [vmem:[%s6613_s30 + $0x44] sm:$0xf] %vm4130_vm15, %v4573_v22  ;;  %v3958_v3 = vadd.f32 %v4630_v53, %v3860_v45  ;;  %v3863_v60 = vadd.f32 %v6600_v11, %v3862_v9 }
 0x3d0   : > { %v3992_v49 = vmax.f32 %v3960_v2, 0.0  ;;  %v3961_v31 = vadd.f32 %v4635_v16, %v3871_v42 }
 0x3d1   : > { %v3990_v26 = vmax.f32 %v3958_v3, 0.0  ;;  %v3959_v6 = vadd.f32 %v4631_v12, %v3863_v60 }
 0x3d2   : > { %v4578_v61 = vpack.c.bf16 %v3992_v49, %v3992_v49  ;;  %v3993_v19 = vmax.f32 %v3961_v31, 0.0 }
 0x3d3   : > { %v4576_v23 = vpack.c.bf16 %v3990_v26, %v3990_v26  ;;  %v3991_v27 = vmax.f32 %v3959_v6, 0.0  ;;  %v5304_v24 = vpop.f32.mrb[168].mxu0 }
 0x3d4   : > { %4153 = vst.msk [vmem:[%s6613_s30 + $0x58] sm:$0xf] %vm4130_vm15, %v4578_v61  ;;  %v4579_v50 = vpack.c.bf16 %v3993_v19, %v3993_v19  ;;  %v3884_v21 = vadd.f32 %v5304_v24, %v6600_v11  ;;  %v3875_v54 = vpop.f32.mrb[169].mxu0 }
 0x3d5   : > { %4151 = vst.msk [vmem:[%s6613_s30 + $0x50] sm:$0xf] %vm4130_vm15, %v4576_v23  ;;  %v4577_v43 = vpack.c.bf16 %v3991_v27, %v3991_v27  ;;  %v3876_v15 = vadd.f32 %v6600_v11, %v3875_v54  ;;  %v5305_v58 = vpop.f32.mrb[170].mxu0 }
 0x3d6   : > { %4154 = vst.msk [vmem:[%s6613_s30 + $0x5c] sm:$0xf] %vm4130_vm15, %v4579_v50  ;;  %v3964_v35 = vadd.f32 %v4642_v0, %v3884_v21  ;;  %v3887_v13 = vadd.f32 %v5305_v58, %v6600_v11  ;;  %v3878_v8 = vpop.f32.mrb[171].mxu0 }
 0x3d7   : > { %4152 = vst.msk [vmem:[%s6613_s30 + $0x54] sm:$0xf] %vm4130_vm15, %v4577_v43  ;;  %v3962_v48 = vadd.f32 %v4638_v44, %v3876_v15  ;;  %v3879_v52 = vadd.f32 %v6600_v11, %v3878_v8 }
 0x3d8   : > { %v3996_v57 = vmax.f32 %v3964_v35, 0.0  ;;  %v3965_v40 = vadd.f32 %v4643_v55, %v3887_v13 }
 0x3d9   : > { %v3994_v37 = vmax.f32 %v3962_v48, 0.0  ;;  %v3963_v17 = vadd.f32 %v4639_v7, %v3879_v52 }
 0x3da   : > { %v4582_v51 = vpack.c.bf16 %v3996_v57, %v3996_v57  ;;  %v3997_v62 = vmax.f32 %v3965_v40, 0.0 }
 0x3db   : > { %v4580_v34 = vpack.c.bf16 %v3994_v37, %v3994_v37  ;;  %v3995_v10 = vmax.f32 %v3963_v17, 0.0  ;;  %v5308_v38 = vpop.f32.mrb[172].mxu0 }
 0x3dc   : > { %4157 = vst.msk [vmem:[%s6613_s30 + $0x68] sm:$0xf] %vm4130_vm15, %v4582_v51  ;;  %v4583_v33 = vpack.c.bf16 %v3997_v62, %v3997_v62  ;;  %v3900_v47 = vadd.f32 %v5308_v38, %v6600_v11  ;;  %v3891_v63 = vpop.f32.mrb[173].mxu0 }
 0x3dd   : > { %4155 = vst.msk [vmem:[%s6613_s30 + $0x60] sm:$0xf] %vm4130_vm15, %v4580_v34  ;;  %v4581_v20 = vpack.c.bf16 %v3995_v10, %v3995_v10  ;;  %v3892_v18 = vadd.f32 %v6600_v11, %v3891_v63  ;;  %v5309_v5 = vpop.f32.mrb[174].mxu0 }
 0x3de   : > { %4158 = vst.msk [vmem:[%s6613_s30 + $0x6c] sm:$0xf] %vm4130_vm15, %v4583_v33  ;;  %v3968_v4 = vadd.f32 %v4650_v30, %v3900_v47  ;;  %v3903_v32 = vadd.f32 %v5309_v5, %v6600_v11  ;;  %v3894_v53 = vpop.f32.mrb[175].mxu0 }
 0x3df   : > { %4156 = vst.msk [vmem:[%s6613_s30 + $0x64] sm:$0xf] %vm4130_vm15, %v4581_v20  ;;  %v3966_v59 = vadd.f32 %v4646_v14, %v3892_v18  ;;  %v3895_v39 = vadd.f32 %v6600_v11, %v3894_v53 }
 0x3e0   : > { %v4000_v1 = vmax.f32 %v3968_v4, 0.0  ;;  %v3969_v16 = vadd.f32 %v4651_v25, %v3903_v32 }
 0x3e1   : > { %v3998_v22 = vmax.f32 %v3966_v59, 0.0  ;;  %v3967_v45 = vadd.f32 %v4647_v29, %v3895_v39 }
 0x3e2   : > { %v4586_v36 = vpack.c.bf16 %v4000_v1, %v4000_v1  ;;  %v4001_v12 = vmax.f32 %v3969_v16, 0.0 }
 0x3e3   : > { %v4584_v2 = vpack.c.bf16 %v3998_v22, %v3998_v22  ;;  %v3999_v42 = vmax.f32 %v3967_v45, 0.0 }
 0x3e4   : > { %4161 = vst.msk [vmem:[%s6613_s30 + $0x78] sm:$0xf] %vm4130_vm15, %v4586_v36  ;;  %v4587_v9 = vpack.c.bf16 %v4001_v12, %v4001_v12 }
 0x3e5   : > { %4159 = vst.msk [vmem:[%s6613_s30 + $0x70] sm:$0xf] %vm4130_vm15, %v4584_v2  ;;  %v4585_v3 = vpack.c.bf16 %v3999_v42, %v3999_v42 }
 0x3e6   : > { %4162 = vst.msk [vmem:[%s6613_s30 + $0x7c] sm:$0xf] %vm4130_vm15, %v4587_v9 }
 0x3e7   : > { %4160 = vst.msk [vmem:[%s6613_s30 + $0x74] sm:$0xf] %vm4130_vm15, %v4585_v3 }
 0x3e8 PF: > { %s17_s26 = sadd.s32 1, %s5457_s26   ;;  %s6766_s24 = smov %s5453_s25 }
 0x3e9   : > { %p14_p5 = scmp.ge.s32.totalorder %s17_s26, 4   ;;  %s6767_s25 = smov %s6769_s27 }
 0x3eb   :  { %16 = sbr.rel (!%p14_p5) target bundleno = 2 (0x2), region = 89 }

</bundles_post_ra>
